<compile_context>
chip_gen: v7x
topology: tpu7x:2x2x1
jax: 0.10.0
libtpu: 0.0.40
codegen_flags: <defaults>
</compile_context>

<pallas_src>
import functools
import math

import jax
import jax.numpy as jnp
from jax import lax
from jax.experimental import pallas as pl
from jax.experimental.pallas import tpu as pltpu


def _round_up(x, m):
    return (x + m - 1) // m * m


def _cdiv(a, b):
    return -(-a // b)


# ---------------------------------------------------------------------------
# Kernel 1: row-wise L2 normalization over the original last dim
#           (+ cast to the matmul dtype).
# ---------------------------------------------------------------------------
def _l2_normalize_kernel(x_ref, o_ref):
    x = x_ref[...].astype(jnp.float32)
    norm = jnp.sqrt(jnp.sum(x * x, axis=-1, keepdims=True))
    # F.normalize(p=2, dim=-1): x / max(||x||, eps)
    o_ref[...] = (x / jnp.maximum(norm, 1e-12)).astype(o_ref.dtype)


def _l2_normalize(x, out_dtype, block_rows, vmem_limit):
    n, d = x.shape
    return pl.pallas_call(
        _l2_normalize_kernel,
        out_shape=jax.ShapeDtypeStruct((n, d), out_dtype),
        grid_spec=pltpu.PrefetchScalarGridSpec(
            num_scalar_prefetch=0,
            grid=(n // block_rows,),
            in_specs=[pl.BlockSpec((block_rows, d), lambda i: (i, 0))],
            out_specs=pl.BlockSpec((block_rows, d), lambda i: (i, 0)),
        ),
        compiler_params=pltpu.CompilerParams(
            dimension_semantics=("parallel",),
            vmem_limit_bytes=int(vmem_limit)),
    )(x)


# ---------------------------------------------------------------------------
# Kernel 2: tiled online log-sum-exp of the similarity matrix (denominator of
# the SupCon softmax), diagonal and padded columns excluded.
#   grid = (num_query_blocks [parallel], num_key_blocks [arbitrary, last]).
# ---------------------------------------------------------------------------
def _supcon_lse_kernel(q_ref, k_ref, o_ref, m_sc, l_sc, *,
                       inv_temp, n_valid, n_pad, tq, tk):
    qi = pl.program_id(0)
    ki = pl.program_id(1)
    nk = pl.num_programs(1)

    @pl.when(ki == 0)
    def _init():
        m_sc[...] = jnp.full(m_sc.shape, -jnp.inf, dtype=m_sc.dtype)
        l_sc[...] = jnp.zeros(l_sc.shape, dtype=l_sc.dtype)

    def online_update(kill_mask_fn):
        # Fold the temperature into the (tq, D) anchor operand — much cheaper
        # than scaling the (tq, tk) scores tile.
        q = q_ref[...]
        q = q * jnp.array(inv_temp, dtype=q.dtype)
        # (TQ, TK) similarity tile on the MXU: contract the last dims of both
        # operands (A @ B^T without a transpose), f32 accumulation.
        scores = lax.dot_general(
            q, k_ref[...],
            dimension_numbers=(((1,), (1,)), ((), ())),
            preferred_element_type=jnp.float32)
        # Online LSE over the UNMASKED scores: the diagonal / padded columns
        # only raise the shift (LSE is shift-invariant); their exp terms are
        # zeroed before the row sum on the few tiles that contain them.
        m_prev = m_sc[...]
        m_new = jnp.maximum(m_prev, jnp.max(scores, axis=1, keepdims=True))
        p = jnp.exp(scores - m_new)
        if kill_mask_fn is not None:
            p = jnp.where(kill_mask_fn(), 0.0, p)
        l_sc[...] = (jnp.exp(m_prev - m_new) * l_sc[...]
                     + jnp.sum(p, axis=1, keepdims=True))
        m_sc[...] = m_new

    is_diag = qi == ki                       # square tiles: diagonal lands here
    if n_pad > n_valid:                      # trace-time: padding exists at all?
        special = jnp.logical_or(is_diag, ki == nk - 1)
    else:
        special = is_diag

    @pl.when(jnp.logical_not(special))
    def _interior():                         # bulk of the tiles: no mask work
        online_update(None)

    @pl.when(special)
    def _edge():                             # diagonal and/or padded key block
        def kill():
            rows = qi * tq + lax.broadcasted_iota(jnp.int32, (tq, tk), 0)
            cols = ki * tk + lax.broadcasted_iota(jnp.int32, (tq, tk), 1)
            km = rows == cols                          # self-similarity
            if n_pad > n_valid:
                km = jnp.logical_or(km, cols >= n_valid)   # zero-padded keys
            return km
        online_update(kill)

    @pl.when(ki == nk - 1)
    def _finalize():
        # log of the masked softmax denominator, per anchor row.
        o_ref[...] = m_sc[...] + jnp.log(l_sc[...])


# ---------------------------------------------------------------------------
# Wrapper: full SupConLoss.forward.
# ---------------------------------------------------------------------------
def supcon_loss(features, labels=None, mask=None, mask2=None,
                temperature=0.07, contrast_mode="all",
                matmul_dtype=jnp.bfloat16):
    """JAX/Pallas equivalent of SupConLoss.forward.

    Supports labels=None (SimCLR) and the `labels` path, contrast_mode
    'all' / 'one'.  matmul_dtype=jnp.bfloat16 (default) runs the similarity
    matmul at bf16 MXU throughput with f32 accumulation; pass jnp.float32 for
    parity with an f32 reference.  Anchors with zero positives produce NaN,
    matching the PyTorch 0/0 behavior.
    """
    if features.ndim < 3:
        raise ValueError("`features` needs to be [bsz, n_views, ...]")
    if labels is not None and mask is not None:
        raise ValueError("Cannot define both `labels` and `mask`")
    if mask is not None or mask2 is not None:
        # TODO(synk): arbitrary/asymmetric `mask=` and `mask2=` (dynamic row
        # filter) paths need an int8 N x N mask stream; not implemented here.
        raise NotImplementedError("custom `mask=` / `mask2=` paths not implemented")
    if contrast_mode not in ("all", "one"):
        raise ValueError(f"Unknown mode: {contrast_mode}")

    B, V = features.shape[0], features.shape[1]
    d_last = features.shape[-1]
    D = int(math.prod(features.shape[2:]))          # flattened feature size
    M = B * V * (D // d_last)                       # rows normalized over d_last
    N = V * B                                       # contrast samples
    n_anchor = N if contrast_mode == "all" else B
    itemsize = jnp.dtype(matmul_dtype).itemsize
    inv_temp = float(1.0 / temperature)

    # Group indices (equal index <=> positive pair) + closed-form counts.
    if labels is None:
        gidx_b = jnp.arange(B, dtype=jnp.int32)
    else:
        lab = jnp.asarray(labels).reshape(-1)
        if lab.shape[0] != B:
            raise ValueError("Num of labels does not match num of features")
        # Map each label to the index of its first occurrence (O(B^2), tiny).
        gidx_b = jnp.argmax(lab[None, :] == lab[:, None], axis=1).astype(jnp.int32)
    group_size_b = jnp.sum(gidx_b[:, None] == gidx_b[None, :], axis=1)
    counts_b = (V * group_size_b - 1).astype(jnp.float32)     # positives/anchor
    gidx_n = jnp.tile(gidx_b, V)                              # view-major [N]
    counts_n = jnp.tile(counts_b, V)

    # ---- Kernel 1: normalize over the ORIGINAL last dim, once per row. -----
    x2 = jnp.asarray(features, jnp.float32).reshape(M, d_last)
    dl_pad = _round_up(d_last, 128)
    ln_rows = 512
    while ln_rows > 8 and ln_rows * dl_pad * (8 + 2 * itemsize) > 12 * 2**20:
        ln_rows //= 2
    ln_vmem = min(48 * 2**20,
                  max(16 * 2**20, ln_rows * dl_pad * (8 + 2 * itemsize) + 4 * 2**20))
    M_pad = _round_up(M, ln_rows)
    x2p = jnp.pad(x2, ((0, M_pad - M), (0, dl_pad - d_last)))
    xn = _l2_normalize(x2p, matmul_dtype, ln_rows, ln_vmem)[:M, :d_last]

    # torch.cat(torch.unbind(features, dim=1), dim=0) -> view-major [N, D].
    contrast = jnp.transpose(xn.reshape(B, V, D), (1, 0, 2)).reshape(N, D)

    # ---- Positive-pair numerator: O(N*D) segment-sum in the wrapper. -------
    fn32 = contrast.astype(jnp.float32)
    seg = jax.ops.segment_sum(fn32, gidx_n, num_segments=B)        # (B, D)
    pos_dot = (jnp.sum(fn32 * seg[gidx_n], axis=-1)
               - jnp.sum(fn32 * fn32, axis=-1))                    # exclude self
    pos_sum = pos_dot * inv_temp                                   # (N,)

    # ---- Tiling: pick the tile first, then pad N up to it. -----------------
    D_pad = _round_up(D, 128)
    tile = 128
    for cand in (512, 256):
        need = 2 * 2 * cand * D_pad * itemsize + 6 * cand * cand * 4
        if need <= 28 * 2**20:
            tile = cand
            break
    # v7x has 2 TensorCores: make the parallel (query) axis >= 2 blocks when
    # the problem allows it.
    while tile > 128 and _cdiv(n_anchor, tile) < 2:
        tile //= 2
    tq = tk = tile
    N_pad = _round_up(N, tile)
    nq = _cdiv(n_anchor, tq)                  # anchors are a prefix of contrast
    nk = N_pad // tk

    feat_c = jnp.pad(contrast, ((0, N_pad - N), (0, D_pad - D)))

    vmem_limit = int(min(
        48 * 2**20,
        max(32 * 2**20,
            4 * tile * D_pad * itemsize + 8 * tile * tile * 4 + 4 * 2**20)))

    kernel = functools.partial(
        _supcon_lse_kernel,
        inv_temp=inv_temp, n_valid=N, n_pad=N_pad, tq=tq, tk=tk)

    log_denom = pl.pallas_call(
        kernel,
        out_shape=jax.ShapeDtypeStruct((nq * tq, 1), jnp.float32),
        grid_spec=pltpu.PrefetchScalarGridSpec(
            num_scalar_prefetch=0,
            grid=(nq, nk),
            in_specs=[
                pl.BlockSpec((tq, D_pad), lambda i, j: (i, 0)),   # anchor rows
                pl.BlockSpec((tk, D_pad), lambda i, j: (j, 0)),   # key rows
            ],
            out_specs=pl.BlockSpec((tq, 1), lambda i, j: (i, 0)),
            scratch_shapes=[
                pltpu.VMEM((tq, 1), jnp.float32),   # running max
                pltpu.VMEM((tq, 1), jnp.float32),   # running sum-exp
            ],
        ),
        compiler_params=pltpu.CompilerParams(
            dimension_semantics=("parallel", "arbitrary"),
            vmem_limit_bytes=vmem_limit),
    )(feat_c, feat_c)

    # Cheap O(N) epilogue in JAX: mean over the real anchor rows.
    mean_log_prob_pos = (pos_sum[:n_anchor] / counts_n[:n_anchor]
                         - log_denom[:n_anchor, 0])
    return -jnp.mean(mean_log_prob_pos)


# ---------------------------------------------------------------------------
# Pure-JAX (f32) reference matching the PyTorch module.
# ---------------------------------------------------------------------------
def _reference_supcon(features, labels=None, temperature=0.07,
                      contrast_mode="all"):
    B, V = features.shape[0], features.shape[1]
    f32 = jnp.asarray(features, jnp.float32)
    norm = jnp.sqrt(jnp.sum(f32 * f32, axis=-1, keepdims=True))
    f32 = f32 / jnp.maximum(norm, 1e-12)
    feats = f32.reshape(B, V, -1)
    contrast = jnp.transpose(feats, (1, 0, 2)).reshape(V * B, -1)
    N = V * B
    if contrast_mode == "one":
        anchor, anchor_count = contrast[:B], 1
    else:
        anchor, anchor_count = contrast, V
    N_a = anchor.shape[0]
    adc = (anchor @ contrast.T) / temperature
    if labels is None:
        base = jnp.eye(B, dtype=jnp.float32)
    else:
        lbl = jnp.asarray(labels).reshape(-1, 1)
        base = (lbl == lbl.T).astype(jnp.float32)
    m = jnp.tile(base, (anchor_count, V))
    logits_mask = jnp.ones((N_a, N)).at[jnp.arange(N_a), jnp.arange(N_a)].set(0.0)
    m = m * logits_mask
    logits = adc - jnp.max(adc, axis=1, keepdims=True)
    exp_logits = jnp.exp(logits) * logits_mask
    log_prob = logits - jnp.log(jnp.sum(exp_logits, axis=1, keepdims=True))
    mlpp = jnp.sum(m * log_prob, axis=1) / jnp.sum(m, axis=1)
    return -jnp.mean(mlpp)


if __name__ == "__main__":
    key = jax.random.PRNGKey(0)
    B, V, D = 8, 2, 32
    features = jax.random.normal(key, (B, V, D), dtype=jnp.float32)

    # SimCLR path (labels=None), exact f32 MXU path.
    loss_f32 = jax.block_until_ready(
        supcon_loss(features, temperature=0.07, matmul_dtype=jnp.float32))
    ref = jax.block_until_ready(_reference_supcon(features, temperature=0.07))
    assert jnp.isfinite(loss_f32), "f32 loss is not finite"
    assert jnp.abs(loss_f32 - ref) < 1e-4 * (1.0 + jnp.abs(ref)), \
        f"f32 mismatch: kernel={loss_f32} ref={ref}"

    # bf16 MXU path (default, faster on all generations) — looser tolerance.
    loss_bf16 = jax.block_until_ready(supcon_loss(features, temperature=0.07))
    assert jnp.isfinite(loss_bf16), "bf16 loss is not finite"
    assert jnp.abs(loss_bf16 - ref) < 5e-2 * (1.0 + jnp.abs(ref)), \
        f"bf16 mismatch: kernel={loss_bf16} ref={ref}"

    # Supervised path (labels given), exact f32 MXU path.
    labels = jnp.array([0, 1, 2, 3, 0, 1, 2, 3], dtype=jnp.int32)
    loss_lab = jax.block_until_ready(
        supcon_loss(features, labels=labels, temperature=0.07,
                    matmul_dtype=jnp.float32))
    ref_lab = jax.block_until_ready(
        _reference_supcon(features, labels=labels, temperature=0.07))
    assert jnp.isfinite(loss_lab), "labels-path loss is not finite"
    assert jnp.abs(loss_lab - ref_lab) < 1e-4 * (1.0 + jnp.abs(ref_lab)), \
        f"labels-path mismatch: kernel={loss_lab} ref={ref_lab}"

    # contrast_mode='one', exact f32 MXU path.
    loss_one = jax.block_until_ready(
        supcon_loss(features, temperature=0.07, contrast_mode="one",
                    matmul_dtype=jnp.float32))
    ref_one = jax.block_until_ready(
        _reference_supcon(features, temperature=0.07, contrast_mode="one"))
    assert jnp.isfinite(loss_one), "'one'-mode loss is not finite"
    assert jnp.abs(loss_one - ref_one) < 1e-4 * (1.0 + jnp.abs(ref_one)), \
        f"'one'-mode mismatch: kernel={loss_one} ref={ref_one}"

    print("KERNEL_OK")
</pallas_src>

<mosaic_0001>
module attributes {stable_mosaic.version = 11 : i64} {
  func.func @_l2_normalize_kernel(%arg0: i32, %arg1: memref<512x128xf32, #tpu.memory_space<vmem>>, %arg2: memref<512x128xf32, #tpu.memory_space<vmem>>) attributes {dimension_semantics = [#tpu.dimension_semantics<parallel>], iteration_bounds = array<i64: 1>, scalar_prefetch = 0 : i64, scratch_operands = 0 : i64, tpu.core_type = #tpu.core_type<tc>, window_params = [{transform_indices = @transform_0, window_bounds = array<i64: 512, 128>}, {transform_indices = @transform_1, window_bounds = array<i64: 512, 128>}]} {
    %c0 = arith.constant 0 : index
    %c0_0 = arith.constant 0 : index
    %0 = vector.load %arg1[%c0, %c0_0] : memref<512x128xf32, #tpu.memory_space<vmem>>, vector<512x128xf32>
    %1 = arith.mulf %0, %0 : vector<512x128xf32>
    %cst = arith.constant dense<0.000000e+00> : vector<512xf32>
    %2 = vector.multi_reduction <add>, %1, %cst [1] : vector<512x128xf32> to vector<512xf32>
    %3 = vector.shape_cast %2 : vector<512xf32> to vector<512x1xf32>
    %4 = math.sqrt %3 : vector<512x1xf32>
    %cst_1 = arith.constant 9.99999996E-13 : f32
    %5 = vector.broadcast %cst_1 : f32 to vector<512x1xf32>
    %6 = arith.maximumf %4, %5 : vector<512x1xf32>
    %7 = vector.broadcast %6 : vector<512x1xf32> to vector<512x128xf32>
    %8 = arith.divf %0, %7 : vector<512x128xf32>
    %c0_2 = arith.constant 0 : index
    %c0_3 = arith.constant 0 : index
    %9 = vector.load %arg2[%c0_2, %c0_3] : memref<512x128xf32, #tpu.memory_space<vmem>>, vector<512x128xf32>
    tpu.vector_store %arg2[%c0_2, %c0_3], %8 {strides = array<i32>} : memref<512x128xf32, #tpu.memory_space<vmem>>, vector<512x128xf32>,
    return
  }
  func.func @transform_0(%arg0: i32) -> (i32, i32) {
    %c0_i32 = arith.constant 0 : i32
    %c0_i32_0 = arith.constant 0 : i32
    return %arg0, %c0_i32 : i32, i32
  }
  func.func @transform_1(%arg0: i32) -> (i32, i32) {
    %c0_i32 = arith.constant 0 : i32
    %c0_i32_0 = arith.constant 0 : i32
    return %arg0, %c0_i32 : i32, i32
  }
}

</mosaic_0001>

<bundles_post_ra>
// kernel: tpu_custom_call.1
= control target key start
LH: loop header
LB: loop body
LE: loop exit
PB: predicated region body
PF: predicated region fallthrough
CT: control target
= control target key end

     0   :  { %6 = vsyncpa [#allocation3], 0  ;;  %s2152_s0 = inlined_call_operand.hbm [shape: f32[512,128], index: 0, kind: input, shape index: {}]   ;;  %s2153_s1 = inlined_call_operand.hbm [shape: f32[512,128], index: 1, kind: output, shape index: {}]  }
   0x1   :  { %7 = vsyncpa [#allocation4], 0  ;;  %s1351_s6 = smov [#allocation2]   ;;  %s1303_s10 = scalar_lea.hbm %s2152_s0, 8192 }
   0x2   :  { %s13_s7 = sshll.u32 %s1351_s6, 4  ;;  %p1304_p0 = scmp.ne.s32.totalorder %s2152_s0, %s1303_s10  ;;  %s14_s7 = int_to_ptr.vmem [resolvable:$true] %s13_s7 }
   0x3   :  { %p1307_p1 = scmp.lt.u32.totalorder %s1303_s10, %s2152_s0 }
   0x5   :  { %p1309_p2 = pnand %p1307_p1, %p1304_p0 }
   0x7   :  { %1312 = shalt.err (!%p1309_p2)
}
   0x8   :  { %s1313_s15 = scalar_lea.vmem %s14_s7, 8192  ;;  %p1318_p4 = scmp.lt.s32.totalorder %s14_s7, %s14_s7 }
   0x9   :  { %p1314_p3 = scmp.ne.s32.totalorder %s14_s7, %s1313_s15  ;;  %p1319_p5 = scmp.lt.s32.totalorder %s1313_s15, %s1313_s15 }
   0xb   :  { %p1320_p6 = por %p1319_p5, %p1318_p4 }
   0xd   :  { %p1321_p7 = pnand %p1320_p6, %p1314_p3 }
   0xf   :  { %1324 = shalt.err (!%p1321_p7)
}
  0x10   :  { %s1352_s16 = smov 128   ;;  %s1353_s17 = smov 8  }
  0x11   :  { %19 = dma.hbm_to_vmem [thread:$0]  %s2152_s0, 8192, %s14_s7, [#allocation3], %s1352_s16, %s1352_s16, %s1353_s17  }
  0x12   :  { %1347 = dma.done.wait [#allocation3], 8192  }
  0x13   :  { %1348 = vsyncadd [#allocation3], 4294959104  ;;  %v1380_v0 = vld [vmem:[#allocation2 + $0x10] sm:$0xff]  ;;  %v1382_v1 = vld [vmem:[#allocation2] sm:$0xff]  ;;  %s1354_s0 = smov [#allocation5]  }
  0x14   :  { %v1384_v2 = vld [vmem:[#allocation2 + $0x18] sm:$0xff]  ;;  %v89_v3 = vmul.f32 %v1380_v0, %v1380_v0  ;;  %v87_v4 = vmul.f32 %v1382_v1, %v1382_v1  ;;  %v1390_v5 = vld [vmem:[#allocation2 + $0x8] sm:$0xff]  ;;  %v1398_v9 = vld [vmem:[#allocation2 + $0x20] sm:$0xff]  ;;  %s988_s20 = sshll.u32 %s1354_s0, 4  ;;  %s989_s20 = int_to_ptr.vmem [resolvable:$true] %s988_s20 }
  0x15   :  { %v90_v6 = vmul.f32 %v1384_v2, %v1384_v2  ;;  %v88_v7 = vmul.f32 %v1390_v5, %v1390_v5  ;;  %v1396_v8 = vld [vmem:[#allocation2 + $0x28] sm:$0xff]  ;;  %v91_v11 = vmul.f32 %v1398_v9, %v1398_v9  ;;  %v1404_v12 = vld [vmem:[#allocation2 + $0x38] sm:$0xff]  ;;  %v1406_v13 = vld [vmem:[#allocation2 + $0x30] sm:$0xff]  ;;  %s1325_s21 = scalar_lea.vmem %s989_s20, 8192  ;;  %p1330_p9 = scmp.lt.s32.totalorder %s989_s20, %s989_s20 }
  0x16   :  { %155 = vadd.xlane.f32.xlu1 %v89_v3  ;;  %151 = vadd.xlane.f32.xlu0 %v87_v4  ;;  %v92_v10 = vmul.f32 %v1396_v8, %v1396_v8  ;;  %v94_v14 = vmul.f32 %v1404_v12, %v1404_v12  ;;  %v93_v15 = vmul.f32 %v1406_v13, %v1406_v13  ;;  %v1412_v16 = vld [vmem:[#allocation2 + $0x48] sm:$0xff]  ;;  %v1414_v17 = vld [vmem:[#allocation2 + $0x40] sm:$0xff]  ;;  %v1420_v20 = vld [vmem:[#allocation2 + $0x58] sm:$0xff]  ;;  %p1326_p8 = scmp.ne.s32.totalorder %s989_s20, %s1325_s21  ;;  %p1331_p10 = scmp.lt.s32.totalorder %s1325_s21, %s1325_s21 }
  0x17   :  { %v96_v18 = vmul.f32 %v1412_v16, %v1412_v16  ;;  %v95_v19 = vmul.f32 %v1414_v17, %v1414_v17  ;;  %v1422_v21 = vld [vmem:[#allocation2 + $0x50] sm:$0xff]  ;;  %v98_v22 = vmul.f32 %v1420_v20, %v1420_v20  ;;  %v1428_v24 = vld [vmem:[#allocation2 + $0x68] sm:$0xff]  ;;  %v1430_v25 = vld [vmem:[#allocation2 + $0x60] sm:$0xff] }
  0x18   :  { %v97_v23 = vmul.f32 %v1422_v21, %v1422_v21  ;;  %v100_v26 = vmul.f32 %v1428_v24, %v1428_v24  ;;  %v99_v27 = vmul.f32 %v1430_v25, %v1430_v25  ;;  %v1436_v28 = vld [vmem:[#allocation2 + $0x78] sm:$0xff]  ;;  %v1438_v29 = vld [vmem:[#allocation2 + $0x70] sm:$0xff]  ;;  %v1444_v32 = vld [vmem:[#allocation2 + $0x88] sm:$0xff]  ;;  %p1332_p11 = por %p1331_p10, %p1330_p9 }
  0x19   :  { %v102_v30 = vmul.f32 %v1436_v28, %v1436_v28  ;;  %v101_v31 = vmul.f32 %v1438_v29, %v1438_v29  ;;  %v1446_v33 = vld [vmem:[#allocation2 + $0x80] sm:$0xff]  ;;  %v104_v34 = vmul.f32 %v1444_v32, %v1444_v32  ;;  %v1452_v36 = vld [vmem:[#allocation2 + $0x98] sm:$0xff]  ;;  %v1454_v37 = vld [vmem:[#allocation2 + $0x90] sm:$0xff] }
  0x1a   :  { %157 = vadd.xlane.f32.xlu1 %v90_v6  ;;  %153 = vadd.xlane.f32.xlu0 %v88_v7  ;;  %v103_v35 = vmul.f32 %v1446_v33, %v1446_v33  ;;  %v106_v38 = vmul.f32 %v1452_v36, %v1452_v36  ;;  %v105_v39 = vmul.f32 %v1454_v37, %v1454_v37  ;;  %v1460_v40 = vld [vmem:[#allocation2 + $0xa8] sm:$0xff]  ;;  %v43_v41 = vld [vmem:[#allocation2 + $0xa0] sm:$0xff]  ;;  %v46_v44 = vld [vmem:[#allocation2 + $0xb8] sm:$0xff]  ;;  %p1333_p12 = pnand %p1332_p11, %p1326_p8 }
  0x1b   :  { %v108_v42 = vmul.f32 %v1460_v40, %v1460_v40  ;;  %v107_v43 = vmul.f32 %v43_v41, %v43_v41  ;;  %v45_v45 = vld [vmem:[#allocation2 + $0xb0] sm:$0xff]  ;;  %v110_v46 = vmul.f32 %v46_v44, %v46_v44  ;;  %v48_v48 = vld [vmem:[#allocation2 + $0xc8] sm:$0xff]  ;;  %v47_v49 = vld [vmem:[#allocation2 + $0xc0] sm:$0xff] }
  0x1c   :  { %v109_v47 = vmul.f32 %v45_v45, %v45_v45  ;;  %v112_v50 = vmul.f32 %v48_v48, %v48_v48  ;;  %v111_v51 = vmul.f32 %v47_v49, %v47_v49  ;;  %v50_v52 = vld [vmem:[#allocation2 + $0xd8] sm:$0xff]  ;;  %v49_v53 = vld [vmem:[#allocation2 + $0xd0] sm:$0xff]  ;;  %v52_v56 = vld [vmem:[#allocation2 + $0xe8] sm:$0xff] }
  0x1d   :  { %v114_v54 = vmul.f32 %v50_v52, %v50_v52  ;;  %v113_v55 = vmul.f32 %v49_v53, %v49_v53  ;;  %v51_v57 = vld [vmem:[#allocation2 + $0xe0] sm:$0xff]  ;;  %v116_v58 = vmul.f32 %v52_v56, %v52_v56  ;;  %v54_v60 = vld [vmem:[#allocation2 + $0xf8] sm:$0xff]  ;;  %v53_v61 = vld [vmem:[#allocation2 + $0xf0] sm:$0xff] }
  0x1e   :  { %161 = vadd.xlane.f32.xlu1 %v92_v10  ;;  %159 = vadd.xlane.f32.xlu0 %v91_v11  ;;  %v115_v59 = vmul.f32 %v51_v57, %v51_v57  ;;  %v118_v62 = vmul.f32 %v54_v60, %v54_v60  ;;  %v117_v63 = vmul.f32 %v53_v61, %v53_v61  ;;  %v56_v3 = vld [vmem:[#allocation2 + $0x108] sm:$0xff]  ;;  %v55_v4 = vld [vmem:[#allocation2 + $0x100] sm:$0xff]  ;;  %v58_v10 = vld [vmem:[#allocation2 + $0x118] sm:$0xff] }
  0x1f   :  { %v120_v6 = vmul.f32 %v56_v3, %v56_v3  ;;  %v119_v7 = vmul.f32 %v55_v4, %v55_v4  ;;  %v57_v11 = vld [vmem:[#allocation2 + $0x110] sm:$0xff]  ;;  %v66_v41 = vld [vmem:[#allocation2 + $0x158] sm:$0xff]  ;;  %v68_v45 = vld [vmem:[#allocation2 + $0x168] sm:$0xff] }
  0x20   :  { %v70_v49 = vld [vmem:[#allocation2 + $0x178] sm:$0xff]  ;;  %v72_v53 = vld [vmem:[#allocation2 + $0x188] sm:$0xff] }
  0x21   :  { %v74_v57 = vld [vmem:[#allocation2 + $0x198] sm:$0xff]  ;;  %v76_v61 = vld [vmem:[#allocation2 + $0x1a8] sm:$0xff] }
  0x22   :  { %165 = vadd.xlane.f32.xlu1 %v94_v14  ;;  %163 = vadd.xlane.f32.xlu0 %v93_v15  ;;  %v122_v14 = vmul.f32 %v58_v10, %v58_v10  ;;  %v121_v15 = vmul.f32 %v57_v11, %v57_v11  ;;  %v78_v4 = vld [vmem:[#allocation2 + $0x1b8] sm:$0xff]  ;;  %v80_v11 = vld [vmem:[#allocation2 + $0x1c8] sm:$0xff] }
  0x26   :  { %169 = vadd.xlane.f32.xlu1 %v96_v18  ;;  %167 = vadd.xlane.f32.xlu0 %v95_v19  ;;  %v60_v18 = vld [vmem:[#allocation2 + $0x128] sm:$0xff]  ;;  %v59_v19 = vld [vmem:[#allocation2 + $0x120] sm:$0xff] }
  0x2a   :  { %173 = vadd.xlane.f32.xlu1 %v98_v22  ;;  %171 = vadd.xlane.f32.xlu0 %v97_v23  ;;  %v124_v22 = vmul.f32 %v60_v18, %v60_v18  ;;  %v123_v23 = vmul.f32 %v59_v19, %v59_v19  ;;  %v82_v19 = vld [vmem:[#allocation2 + $0x1d8] sm:$0xff] }
  0x2e   :  { %177 = vadd.xlane.f32.xlu1 %v100_v26  ;;  %175 = vadd.xlane.f32.xlu0 %v99_v27  ;;  %v62_v26 = vld [vmem:[#allocation2 + $0x138] sm:$0xff]  ;;  %v61_v27 = vld [vmem:[#allocation2 + $0x130] sm:$0xff] }
  0x32   :  { %181 = vadd.xlane.f32.xlu1 %v102_v30  ;;  %179 = vadd.xlane.f32.xlu0 %v101_v31  ;;  %v126_v30 = vmul.f32 %v62_v26, %v62_v26  ;;  %v125_v31 = vmul.f32 %v61_v27, %v61_v27  ;;  %v84_v27 = vld [vmem:[#allocation2 + $0x1e8] sm:$0xff] }
  0x36   :  { %185 = vadd.xlane.f32.xlu1 %v104_v34  ;;  %183 = vadd.xlane.f32.xlu0 %v103_v35  ;;  %v64_v34 = vld [vmem:[#allocation2 + $0x148] sm:$0xff]  ;;  %v63_v35 = vld [vmem:[#allocation2 + $0x140] sm:$0xff] }
  0x3a   :  { %189 = vadd.xlane.f32.xlu1 %v106_v38  ;;  %187 = vadd.xlane.f32.xlu0 %v105_v39  ;;  %v128_v38 = vmul.f32 %v64_v34, %v64_v34  ;;  %v127_v39 = vmul.f32 %v63_v35, %v63_v35  ;;  %v86_v35 = vld [vmem:[#allocation2 + $0x1f8] sm:$0xff] }
  0x3e   :  { %193 = vadd.xlane.f32.xlu1 %v108_v42  ;;  %191 = vadd.xlane.f32.xlu0 %v107_v43  ;;  %v65_v42 = vld [vmem:[#allocation2 + $0x150] sm:$0xff]  ;;  %v130_v43 = vmul.f32 %v66_v41, %v66_v41 }
  0x3f   :  { %v129_v44 = vmul.f32 %v65_v42, %v65_v42 }
  0x42   :  { %197 = vadd.xlane.f32.xlu1 %v110_v46  ;;  %195 = vadd.xlane.f32.xlu0 %v109_v47  ;;  %v67_v46 = vld [vmem:[#allocation2 + $0x160] sm:$0xff]  ;;  %v132_v47 = vmul.f32 %v68_v45, %v68_v45 }
  0x43   :  { %v131_v48 = vmul.f32 %v67_v46, %v67_v46 }
  0x46   :  { %201 = vadd.xlane.f32.xlu1 %v112_v50  ;;  %199 = vadd.xlane.f32.xlu0 %v111_v51  ;;  %v69_v50 = vld [vmem:[#allocation2 + $0x170] sm:$0xff]  ;;  %v134_v51 = vmul.f32 %v70_v49, %v70_v49 }
  0x47   :  { %v133_v52 = vmul.f32 %v69_v50, %v69_v50 }
  0x4a   :  { %205 = vadd.xlane.f32.xlu1 %v114_v54  ;;  %203 = vadd.xlane.f32.xlu0 %v113_v55  ;;  %v71_v54 = vld [vmem:[#allocation2 + $0x180] sm:$0xff]  ;;  %v136_v55 = vmul.f32 %v72_v53, %v72_v53 }
  0x4b   :  { %v135_v56 = vmul.f32 %v71_v54, %v71_v54 }
  0x4e   :  { %209 = vadd.xlane.f32.xlu1 %v116_v58  ;;  %207 = vadd.xlane.f32.xlu0 %v115_v59  ;;  %v73_v58 = vld [vmem:[#allocation2 + $0x190] sm:$0xff]  ;;  %v138_v59 = vmul.f32 %v74_v57, %v74_v57 }
  0x4f   :  { %v137_v60 = vmul.f32 %v73_v58, %v73_v58 }
  0x52   :  { %213 = vadd.xlane.f32.xlu1 %v118_v62  ;;  %211 = vadd.xlane.f32.xlu0 %v117_v63  ;;  %v75_v62 = vld [vmem:[#allocation2 + $0x1a0] sm:$0xff]  ;;  %v140_v63 = vmul.f32 %v76_v61, %v76_v61 }
  0x53   :  { %v139_v3 = vmul.f32 %v75_v62, %v75_v62 }
  0x56   :  { %217 = vadd.xlane.f32.xlu1 %v120_v6  ;;  %215 = vadd.xlane.f32.xlu0 %v119_v7  ;;  %v77_v6 = vld [vmem:[#allocation2 + $0x1b0] sm:$0xff]  ;;  %v142_v7 = vmul.f32 %v78_v4, %v78_v4 }
  0x57   :  { %v141_v10 = vmul.f32 %v77_v6, %v77_v6 }
  0x5a   :  { %221 = vadd.xlane.f32.xlu1 %v122_v14  ;;  %219 = vadd.xlane.f32.xlu0 %v121_v15  ;;  %v79_v14 = vld [vmem:[#allocation2 + $0x1c0] sm:$0xff]  ;;  %v144_v15 = vmul.f32 %v80_v11, %v80_v11 }
  0x5b   :  { %v143_v18 = vmul.f32 %v79_v14, %v79_v14 }
  0x5e   :  { %225 = vadd.xlane.f32.xlu1 %v124_v22  ;;  %223 = vadd.xlane.f32.xlu0 %v123_v23  ;;  %v81_v22 = vld [vmem:[#allocation2 + $0x1d0] sm:$0xff]  ;;  %v146_v23 = vmul.f32 %v82_v19, %v82_v19 }
  0x5f   :  { %v145_v26 = vmul.f32 %v81_v22, %v81_v22 }
  0x62   :  { %229 = vadd.xlane.f32.xlu1 %v126_v30  ;;  %227 = vadd.xlane.f32.xlu0 %v125_v31  ;;  %v83_v30 = vld [vmem:[#allocation2 + $0x1e0] sm:$0xff]  ;;  %v148_v31 = vmul.f32 %v84_v27, %v84_v27 }
  0x63   :  { %v147_v34 = vmul.f32 %v83_v30, %v83_v30 }
  0x66   :  { %233 = vadd.xlane.f32.xlu1 %v128_v38  ;;  %231 = vadd.xlane.f32.xlu0 %v127_v39  ;;  %v85_v38 = vld [vmem:[#allocation2 + $0x1f0] sm:$0xff]  ;;  %v150_v39 = vmul.f32 %v86_v35, %v86_v35 }
  0x67   :  { %v149_v41 = vmul.f32 %v85_v38, %v85_v38 }
  0x6a   :  { %237 = vadd.xlane.f32.xlu1 %v130_v43  ;;  %235 = vadd.xlane.f32.xlu0 %v129_v44 }
  0x6e   :  { %241 = vadd.xlane.f32.xlu1 %v132_v47  ;;  %239 = vadd.xlane.f32.xlu0 %v131_v48 }
  0x72   :  { %245 = vadd.xlane.f32.xlu1 %v134_v51  ;;  %243 = vadd.xlane.f32.xlu0 %v133_v52 }
  0x76   :  { %249 = vadd.xlane.f32.xlu1 %v136_v55  ;;  %247 = vadd.xlane.f32.xlu0 %v135_v56 }
  0x7a   :  { %253 = vadd.xlane.f32.xlu1 %v138_v59  ;;  %251 = vadd.xlane.f32.xlu0 %v137_v60 }
  0x7e   :  { %257 = vadd.xlane.f32.xlu1 %v140_v63  ;;  %255 = vadd.xlane.f32.xlu0 %v139_v3 }
  0x82   :  { %261 = vadd.xlane.f32.xlu1 %v142_v7  ;;  %259 = vadd.xlane.f32.xlu0 %v141_v10 }
  0x86   :  { %265 = vadd.xlane.f32.xlu1 %v144_v15  ;;  %263 = vadd.xlane.f32.xlu0 %v143_v18 }
  0x8a   :  { %269 = vadd.xlane.f32.xlu1 %v146_v23  ;;  %267 = vadd.xlane.f32.xlu0 %v145_v26 }
  0x8e   :  { %273 = vadd.xlane.f32.xlu1 %v148_v31  ;;  %271 = vadd.xlane.f32.xlu0 %v147_v34 }
  0x92   :  { %277 = vadd.xlane.f32.xlu1 %v150_v39  ;;  %275 = vadd.xlane.f32.xlu0 %v149_v41 }
  0xa3   :  { %v156_v42 = vpop.xlane.xlu1 %155  ;;  %v152_v43 = vpop.xlane.xlu0 %151 }
  0xa4   :  { %1004 = vrsqrt.f32 %v156_v42  ;;  %vm295_vm0 = vcmp.eq.f32.partialorder %v156_v42, inf  ;;  %vm297_vm1 = vcmp.eq.f32.partialorder %v156_v42, 0.0  ;;  %v298_v49 = vand.u32 2147483648, %v156_v42 }
  0xa5   :  { %1006 = vrsqrt.f32 %v152_v43  ;;  %vm281_vm2 = vcmp.eq.f32.partialorder %v152_v43, inf  ;;  %vm283_vm3 = vcmp.eq.f32.partialorder %v152_v43, 0.0  ;;  %v284_v52 = vand.u32 2147483648, %v152_v43 }
  0xa7   :  { %v158_v44 = vpop.xlane.xlu1 %157  ;;  %v154_v45 = vpop.xlane.xlu0 %153 }
  0xa8   :  { %1008 = vrsqrt.f32 %v158_v44  ;;  %vm302_vm4 = vcmp.eq.f32.partialorder %v158_v44, inf  ;;  %vm304_vm5 = vcmp.eq.f32.partialorder %v158_v44, 0.0  ;;  %v305_v57 = vand.u32 2147483648, %v158_v44 }
  0xa9   :  { %1010 = vrsqrt.f32 %v154_v45  ;;  %vm288_vm6 = vcmp.eq.f32.partialorder %v154_v45, inf  ;;  %vm290_vm7 = vcmp.eq.f32.partialorder %v154_v45, 0.0  ;;  %v291_v61 = vand.u32 2147483648, %v154_v45 }
  0xab   :  { %v1464_v46 = vpop.xlane.xlu1 %161  ;;  %v1466_v47 = vpop.xlane.xlu0 %159 }
  0xac   :  { %1012 = vrsqrt.f32 %v1464_v46  ;;  %vm316_vm8 = vcmp.eq.f32.partialorder %v1464_v46, inf  ;;  %vm318_vm9 = vcmp.eq.f32.partialorder %v1464_v46, 0.0  ;;  %v319_v15 = vand.u32 2147483648, %v1464_v46 }
  0xad   :  { %1014 = vrsqrt.f32 %v1466_v47  ;;  %vm309_vm10 = vcmp.eq.f32.partialorder %v1466_v47, inf  ;;  %vm311_vm11 = vcmp.eq.f32.partialorder %v1466_v47, 0.0  ;;  %v312_v39 = vand.u32 2147483648, %v1466_v47 }
  0xae   :  { %v1005_v48 = vpop.eup %1004 }
  0xaf   :  { %v1007_v50 = vpop.eup %1006  ;;  %v294_v51 = vmul.f32 %v1005_v48, %v156_v42  ;;  %v1470_v53 = vpop.xlane.xlu1 %165 }
  0xb0   :  { %v1472_v54 = vpop.xlane.xlu0 %163  ;;  %v280_v55 = vmul.f32 %v1007_v50, %v152_v43  ;;  %1016 = vrsqrt.f32 %v1470_v53  ;;  %vm330_vm12 = vcmp.eq.f32.partialorder %v1470_v53, inf  ;;  %vm332_vm13 = vcmp.eq.f32.partialorder %v1470_v53, 0.0 }
  0xb1   :  { %v296_v56 = vsel %vm295_vm0, %v156_v42, %v294_v51  ;;  %1018 = vrsqrt.f32 %v1472_v54  ;;  %v333_v42 = vand.u32 2147483648, %v1470_v53  ;;  %vm323_vm14 = vcmp.eq.f32.partialorder %v1472_v54, inf }
  0xb2   :  { %v1009_v58 = vpop.eup %1008  ;;  %v299_v59 = vsel %vm297_vm1, %v298_v49, %v296_v56  ;;  %v282_v60 = vsel %vm281_vm2, %v152_v43, %v280_v55  ;;  %vm325_vm15 = vcmp.eq.f32.partialorder %v1472_v54, 0.0 }
  0xb3   :  { %v1011_v62 = vpop.eup %1010  ;;  %v729_v63 = vmax.f32 %v299_v59, 1e-12  ;;  %v285_v3 = vsel %vm283_vm3, %v284_v52, %v282_v60  ;;  %v301_v4 = vmul.f32 %v1009_v58, %v158_v44  ;;  %v1479_v6 = vpop.xlane.xlu1 %169 }
  0xb4   :  { %v1481_v7 = vpop.xlane.xlu0 %167  ;;  %v727_v10 = vmax.f32 %v285_v3, 1e-12  ;;  %v287_v11 = vmul.f32 %v1011_v62, %v154_v45  ;;  %1020 = vrsqrt.f32 %v1479_v6  ;;  %vm344_vm0 = vcmp.eq.f32.partialorder %v1479_v6, inf }
  0xb5   :  { %1022 = vrcp.f32 %v729_v63  ;;  %v303_v14 = vsel %vm302_vm4, %v158_v44, %v301_v4  ;;  %vm346_vm1 = vcmp.eq.f32.partialorder %v1479_v6, 0.0  ;;  %vm337_vm2 = vcmp.eq.f32.partialorder %v1481_v7, inf }
  0xb6   :  { %v1013_v18 = vpop.eup %1012  ;;  %1024 = vrcp.f32 %v727_v10  ;;  %v306_v19 = vsel %vm304_vm5, %v305_v57, %v303_v14  ;;  %v289_v22 = vsel %vm288_vm6, %v154_v45, %v287_v11  ;;  %v326_v57 = vand.u32 2147483648, %v1472_v54 }
  0xb7   :  { %v1015_v23 = vpop.eup %1014  ;;  %v730_v26 = vmax.f32 %v306_v19, 1e-12  ;;  %v292_v27 = vsel %vm290_vm7, %v291_v61, %v289_v22  ;;  %v315_v30 = vmul.f32 %v1013_v18, %v1464_v46  ;;  %1026 = vrsqrt.f32 %v1481_v7  ;;  %v1494_v31 = vpop.xlane.xlu1 %173 }
  0xb8   :  { %v1496_v34 = vpop.xlane.xlu0 %171  ;;  %v728_v35 = vmax.f32 %v292_v27, 1e-12  ;;  %v308_v38 = vmul.f32 %v1015_v23, %v1466_v47  ;;  %vm339_vm3 = vcmp.eq.f32.partialorder %v1481_v7, 0.0  ;;  %v340_v23 = vand.u32 2147483648, %v1481_v7 }
  0xb9   :  { %1028 = vrcp.f32 %v730_v26  ;;  %v317_v41 = vsel %vm316_vm8, %v1464_v46, %v315_v30  ;;  %vm358_vm4 = vcmp.eq.f32.partialorder %v1494_v31, inf  ;;  %vm360_vm5 = vcmp.eq.f32.partialorder %v1494_v31, 0.0 }
  0xba   :  { %v1017_v43 = vpop.eup %1016  ;;  %1030 = vrcp.f32 %v728_v35  ;;  %v320_v44 = vsel %vm318_vm9, %v319_v15, %v317_v41  ;;  %v310_v45 = vsel %vm309_vm10, %v1466_v47, %v308_v38  ;;  %v347_v15 = vand.u32 2147483648, %v1479_v6 }
  0xbb   :  { %v1019_v48 = vpop.eup %1018  ;;  %v732_v49 = vmax.f32 %v320_v44, 1e-12  ;;  %v313_v50 = vsel %vm311_vm11, %v312_v39, %v310_v45  ;;  %v329_v51 = vmul.f32 %v1017_v43, %v1470_v53  ;;  %1032 = vrsqrt.f32 %v1494_v31  ;;  %v1516_v52 = vpop.xlane.xlu1 %177 }
  0xbc   :  { %v1518_v55 = vpop.xlane.xlu0 %175  ;;  %v731_v46 = vmax.f32 %v313_v50, 1e-12  ;;  %v322_v56 = vmul.f32 %v1019_v48, %v1472_v54  ;;  %1034 = vrsqrt.f32 %v1496_v34  ;;  %v361_v39 = vand.u32 2147483648, %v1494_v31 }
  0xbd   :  { %1036 = vrcp.f32 %v732_v49  ;;  %v331_v47 = vsel %vm330_vm12, %v1470_v53, %v329_v51  ;;  %vm351_vm6 = vcmp.eq.f32.partialorder %v1496_v34, inf  ;;  %vm353_vm7 = vcmp.eq.f32.partialorder %v1496_v34, 0.0 }
  0xbe   :  { %v1021_v58 = vpop.eup %1020  ;;  %1038 = vrcp.f32 %v731_v46  ;;  %v334_v59 = vsel %vm332_vm13, %v333_v42, %v331_v47  ;;  %v324_v60 = vsel %vm323_vm14, %v1472_v54, %v322_v56  ;;  %vm372_vm8 = vcmp.eq.f32.partialorder %v1516_v52, inf }
  0xbf   :  { %v1023_v61 = vpop.eup %1022  ;;  %v734_v62 = vmax.f32 %v334_v59, 1e-12  ;;  %v327_v63 = vsel %vm325_vm15, %v326_v57, %v324_v60  ;;  %v343_v3 = vmul.f32 %v1021_v58, %v1479_v6  ;;  %1040 = vrsqrt.f32 %v1516_v52  ;;  %v1536_v4 = vpop.xlane.xlu1 %181 }
  0xc0   :  { %v1538_v10 = vpop.xlane.xlu0 %179  ;;  %v1025_v11 = vpop.eup %1024  ;;  %v796_v53 = vmul.f32 %v1023_v61, %v1380_v0  ;;  %v733_v14 = vmax.f32 %v327_v63, 1e-12  ;;  %vm374_vm9 = vcmp.eq.f32.partialorder %v1516_v52, 0.0  ;;  %v375_v60 = vand.u32 2147483648, %v1516_v52 }
  0xc1   :  { %v1027_v54 = vpop.eup %1026  ;;  %v792_v18 = vmul.f32 %v1025_v11, %v1382_v1  ;;  %1042 = vrcp.f32 %v734_v62  ;;  %v345_v19 = vsel %vm344_vm0, %v1479_v6, %v343_v3  ;;  %vm365_vm10 = vcmp.eq.f32.partialorder %v1518_v55, inf }
  0xc2   :  { %921 = vst [vmem:[#allocation5 + $0x10] sm:$0xff] %v796_v53  ;;  %1044 = vrcp.f32 %v733_v14  ;;  %v348_v0 = vsel %vm346_vm1, %v347_v15, %v345_v19  ;;  %v336_v22 = vmul.f32 %v1027_v54, %v1481_v7  ;;  %vm367_vm11 = vcmp.eq.f32.partialorder %v1518_v55, 0.0 }
  0xc3   :  { %v1029_v26 = vpop.eup %1028  ;;  %919 = vst [vmem:[#allocation5] sm:$0xff] %v792_v18  ;;  %v736_v27 = vmax.f32 %v348_v0, 1e-12  ;;  %1046 = vrsqrt.f32 %v1518_v55  ;;  %v1555_v1 = vpop.xlane.xlu1 %185  ;;  %vm386_vm12 = vcmp.eq.f32.partialorder %v1536_v4, inf  ;;  %vm388_vm13 = vcmp.eq.f32.partialorder %v1536_v4, 0.0 }
  0xc4   :  { %v1557_v30 = vpop.xlane.xlu0 %183  ;;  %v1031_v35 = vpop.eup %1030  ;;  %v798_v6 = vmul.f32 %v1029_v26, %v1384_v2  ;;  %v338_v38 = vsel %vm337_vm2, %v1481_v7, %v336_v22  ;;  %1048 = vrsqrt.f32 %v1536_v4  ;;  %v389_v22 = vand.u32 2147483648, %v1536_v4 }
  0xc5   :  { %v1033_v41 = vpop.eup %1032  ;;  %v794_v42 = vmul.f32 %v1031_v35, %v1390_v5  ;;  %1050 = vrcp.f32 %v736_v27  ;;  %v341_v43 = vsel %vm339_vm3, %v340_v23, %v338_v38  ;;  %v354_v5 = vand.u32 2147483648, %v1496_v34 }
  0xc6   :  { %v1035_v44 = vpop.eup %1034  ;;  %922 = vst [vmem:[#allocation5 + $0x18] sm:$0xff] %v798_v6  ;;  %v735_v2 = vmax.f32 %v341_v43, 1e-12  ;;  %v357_v45 = vmul.f32 %v1033_v41, %v1494_v31  ;;  %1052 = vrsqrt.f32 %v1538_v10  ;;  %vm379_vm14 = vcmp.eq.f32.partialorder %v1538_v10, inf }
  0xc7   :  { %v1037_v48 = vpop.eup %1036  ;;  %920 = vst [vmem:[#allocation5 + $0x8] sm:$0xff] %v794_v42  ;;  %v350_v49 = vmul.f32 %v1035_v44, %v1496_v34  ;;  %1054 = vrsqrt.f32 %v1555_v1  ;;  %v1576_v7 = vpop.xlane.xlu1 %189  ;;  %vm381_vm15 = vcmp.eq.f32.partialorder %v1538_v10, 0.0  ;;  %v382_v38 = vand.u32 2147483648, %v1538_v10 }
  0xc8   :  { %v1578_v50 = vpop.xlane.xlu0 %187  ;;  %v1039_v51 = vpop.eup %1038  ;;  %v802_v46 = vmul.f32 %v1037_v48, %v1396_v8  ;;  %1056 = vrcp.f32 %v735_v2  ;;  %v359_v56 = vsel %vm358_vm4, %v1494_v31, %v357_v45  ;;  %v368_v31 = vand.u32 2147483648, %v1518_v55 }
  0xc9   :  { %v1041_v47 = vpop.eup %1040  ;;  %v800_v57 = vmul.f32 %v1039_v51, %v1398_v9  ;;  %v362_v58 = vsel %vm360_vm5, %v361_v39, %v359_v56  ;;  %v352_v59 = vsel %vm351_vm6, %v1496_v34, %v350_v49  ;;  %1058 = vrsqrt.f32 %v1557_v30 }
  0xca   :  { %924 = vst [vmem:[#allocation5 + $0x28] sm:$0xff] %v802_v46  ;;  %v738_v8 = vmax.f32 %v362_v58, 1e-12  ;;  %v355_v61 = vsel %vm353_vm7, %v354_v5, %v352_v59  ;;  %v371_v62 = vmul.f32 %v1041_v47, %v1516_v52  ;;  %vm400_vm0 = vcmp.eq.f32.partialorder %v1555_v1, inf }
  0xcb   :  { %v1043_v63 = vpop.eup %1042  ;;  %923 = vst [vmem:[#allocation5 + $0x20] sm:$0xff] %v800_v57  ;;  %v737_v9 = vmax.f32 %v355_v61, 1e-12  ;;  %v1599_v3 = vpop.xlane.xlu1 %193  ;;  %v403_v5 = vand.u32 2147483648, %v1555_v1  ;;  %vm402_vm1 = vcmp.eq.f32.partialorder %v1555_v1, 0.0  ;;  %vm393_vm2 = vcmp.eq.f32.partialorder %v1557_v30, inf }
  0xcc   :  { %v1601_v11 = vpop.xlane.xlu0 %191  ;;  %v1045_v53 = vpop.eup %1044  ;;  %v806_v34 = vmul.f32 %v1043_v63, %v1404_v12  ;;  %1060 = vrcp.f32 %v738_v8  ;;  %v373_v14 = vsel %vm372_vm8, %v1516_v52, %v371_v62  ;;  %vm395_vm3 = vcmp.eq.f32.partialorder %v1557_v30, 0.0 }
  0xcd   :  { %v1047_v15 = vpop.eup %1046  ;;  %v804_v54 = vmul.f32 %v1045_v53, %v1406_v13  ;;  %1062 = vrcp.f32 %v737_v9  ;;  %v376_v18 = vsel %vm374_vm9, %v375_v60, %v373_v14  ;;  %vm414_vm4 = vcmp.eq.f32.partialorder %v1576_v7, inf }
  0xce   :  { %v1049_v19 = vpop.eup %1048  ;;  %926 = vst [vmem:[#allocation5 + $0x38] sm:$0xff] %v806_v34  ;;  %v740_v0 = vmax.f32 %v376_v18, 1e-12  ;;  %v364_v12 = vmul.f32 %v1047_v15, %v1518_v55  ;;  %1064 = vrsqrt.f32 %v1576_v7  ;;  %vm416_vm5 = vcmp.eq.f32.partialorder %v1576_v7, 0.0 }
  0xcf   :  { %v1051_v23 = vpop.eup %1050  ;;  %925 = vst [vmem:[#allocation5 + $0x30] sm:$0xff] %v804_v54  ;;  %v385_v26 = vmul.f32 %v1049_v19, %v1536_v4  ;;  %1066 = vrsqrt.f32 %v1578_v50  ;;  %v1619_v13 = vpop.xlane.xlu1 %197  ;;  %v417_v54 = vand.u32 2147483648, %v1576_v7  ;;  %vm407_vm6 = vcmp.eq.f32.partialorder %v1578_v50, inf }
  0xd0   :  { %v1621_v52 = vpop.xlane.xlu0 %195  ;;  %v1053_v27 = vpop.eup %1052  ;;  %v810_v35 = vmul.f32 %v1051_v23, %v1412_v16  ;;  %1068 = vrcp.f32 %v740_v0  ;;  %v366_v6 = vsel %vm365_vm10, %v1518_v55, %v364_v12  ;;  %v410_v19 = vand.u32 2147483648, %v1578_v50 }
  0xd1   :  { %v1055_v39 = vpop.eup %1054  ;;  %v369_v41 = vsel %vm367_vm11, %v368_v31, %v366_v6  ;;  %v387_v42 = vsel %vm386_vm12, %v1536_v4, %v385_v26  ;;  %v378_v43 = vmul.f32 %v1053_v27, %v1538_v10  ;;  %1070 = vrsqrt.f32 %v1599_v3 }
  0xd2   :  { %v1057_v16 = vpop.eup %1056  ;;  %928 = vst [vmem:[#allocation5 + $0x48] sm:$0xff] %v810_v35  ;;  %v739_v44 = vmax.f32 %v369_v41, 1e-12  ;;  %v390_v2 = vsel %vm388_vm13, %v389_v22, %v387_v42  ;;  %v399_v45 = vmul.f32 %v1055_v39, %v1555_v1  ;;  %vm409_vm7 = vcmp.eq.f32.partialorder %v1578_v50, 0.0 }
  0xd3   :  { %v808_v55 = vmul.f32 %v1057_v16, %v1414_v17  ;;  %v742_v48 = vmax.f32 %v390_v2, 1e-12  ;;  %v380_v49 = vsel %vm379_vm14, %v1538_v10, %v378_v43  ;;  %v1644_v51 = vpop.xlane.xlu1 %201  ;;  %v1059_v17 = vpop.eup %1058  ;;  %vm428_vm8 = vcmp.eq.f32.partialorder %v1599_v3, inf }
  0xd4   :  { %v1646_v46 = vpop.xlane.xlu0 %199  ;;  %1072 = vrcp.f32 %v739_v44  ;;  %v383_v4 = vsel %vm381_vm15, %v382_v38, %v380_v49  ;;  %v401_v56 = vsel %vm400_vm0, %v1555_v1, %v399_v45  ;;  %v392_v60 = vmul.f32 %v1059_v17, %v1557_v30 }
  0xd5   :  { %927 = vst [vmem:[#allocation5 + $0x40] sm:$0xff] %v808_v55  ;;  %1074 = vrcp.f32 %v742_v48  ;;  %v741_v47 = vmax.f32 %v383_v4, 1e-12  ;;  %v404_v57 = vsel %vm402_vm1, %v403_v5, %v401_v56  ;;  %v396_v1 = vand.u32 2147483648, %v1557_v30 }
  0xd6   :  { %v1061_v58 = vpop.eup %1060  ;;  %v744_v59 = vmax.f32 %v404_v57, 1e-12  ;;  %1076 = vrsqrt.f32 %v1601_v11  ;;  %v394_v31 = vsel %vm393_vm2, %v1557_v30, %v392_v60  ;;  %vm430_vm9 = vcmp.eq.f32.partialorder %v1599_v3, 0.0 }
  0xd7   :  { %v1063_v8 = vpop.eup %1062  ;;  %v814_v10 = vmul.f32 %v1061_v58, %v1420_v20  ;;  %1078 = vrcp.f32 %v741_v47  ;;  %v1658_v61 = vpop.xlane.xlu1 %205  ;;  %v397_v20 = vsel %vm395_vm3, %v396_v1, %v394_v31  ;;  %vm421_vm10 = vcmp.eq.f32.partialorder %v1601_v11, inf }
  0xd8   :  { %v1660_v62 = vpop.xlane.xlu0 %203  ;;  %v1065_v63 = vpop.eup %1064  ;;  %v812_v9 = vmul.f32 %v1063_v8, %v1422_v21  ;;  %1080 = vrcp.f32 %v744_v59  ;;  %v743_v15 = vmax.f32 %v397_v20, 1e-12  ;;  %vm423_vm11 = vcmp.eq.f32.partialorder %v1601_v11, 0.0 }
  0xd9   :  { %v1067_v53 = vpop.eup %1066  ;;  %930 = vst [vmem:[#allocation5 + $0x58] sm:$0xff] %v814_v10  ;;  %v413_v34 = vmul.f32 %v1065_v63, %v1576_v7  ;;  %1082 = vrsqrt.f32 %v1619_v13  ;;  %vm442_vm12 = vcmp.eq.f32.partialorder %v1619_v13, inf  ;;  %vm444_vm13 = vcmp.eq.f32.partialorder %v1619_v13, 0.0 }
  0xda   :  { %v1069_v14 = vpop.eup %1068  ;;  %929 = vst [vmem:[#allocation5 + $0x50] sm:$0xff] %v812_v9  ;;  %v406_v21 = vmul.f32 %v1067_v53, %v1578_v50  ;;  %1084 = vrsqrt.f32 %v1621_v52  ;;  %v445_v56 = vand.u32 2147483648, %v1619_v13  ;;  %vm435_vm14 = vcmp.eq.f32.partialorder %v1621_v52, inf }
  0xdb   :  { %v818_v30 = vmul.f32 %v1069_v14, %v1428_v24  ;;  %v415_v18 = vsel %vm414_vm4, %v1576_v7, %v413_v34  ;;  %v1675_v0 = vpop.xlane.xlu1 %209  ;;  %v1071_v22 = vpop.eup %1070  ;;  %1086 = vrcp.f32 %v743_v15  ;;  %v431_v7 = vand.u32 2147483648, %v1599_v3 }
  0xdc   :  { %v1677_v12 = vpop.xlane.xlu0 %207  ;;  %v418_v23 = vsel %vm416_vm5, %v417_v54, %v415_v18  ;;  %v408_v26 = vsel %vm407_vm6, %v1578_v50, %v406_v21  ;;  %v427_v35 = vmul.f32 %v1071_v22, %v1599_v3  ;;  %1088 = vrsqrt.f32 %v1644_v51 }
  0xdd   :  { %932 = vst [vmem:[#allocation5 + $0x68] sm:$0xff] %v818_v30  ;;  %v746_v24 = vmax.f32 %v418_v23, 1e-12  ;;  %v411_v27 = vsel %vm409_vm7, %v410_v19, %v408_v26  ;;  %vm437_vm15 = vcmp.eq.f32.partialorder %v1621_v52, 0.0  ;;  %v438_v60 = vand.u32 2147483648, %v1621_v52 }
  0xde   :  { %v1073_v6 = vpop.eup %1072  ;;  %v745_v38 = vmax.f32 %v411_v27, 1e-12  ;;  %v429_v50 = vsel %vm428_vm8, %v1599_v3, %v427_v35  ;;  %v424_v3 = vand.u32 2147483648, %v1601_v11  ;;  %vm456_vm0 = vcmp.eq.f32.partialorder %v1644_v51, inf }
  0xdf   :  { %v1075_v39 = vpop.eup %1074  ;;  %v816_v41 = vmul.f32 %v1073_v6, %v1430_v25  ;;  %1090 = vrcp.f32 %v746_v24  ;;  %v1691_v42 = vpop.xlane.xlu1 %213  ;;  %v432_v2 = vsel %vm430_vm9, %v431_v7, %v429_v50  ;;  %vm458_vm1 = vcmp.eq.f32.partialorder %v1644_v51, 0.0 }
  0xe0   :  { %v1693_v43 = vpop.xlane.xlu0 %211  ;;  %v1077_v16 = vpop.eup %1076  ;;  %v822_v44 = vmul.f32 %v1075_v39, %v1436_v28  ;;  %1092 = vrcp.f32 %v745_v38  ;;  %v748_v55 = vmax.f32 %v432_v2, 1e-12  ;;  %v459_v15 = vand.u32 2147483648, %v1644_v51 }
  0xe1   :  { %v1079_v45 = vpop.eup %1078  ;;  %931 = vst [vmem:[#allocation5 + $0x60] sm:$0xff] %v816_v41  ;;  %v420_v25 = vmul.f32 %v1077_v16, %v1601_v11  ;;  %1094 = vrsqrt.f32 %v1646_v46  ;;  %vm449_vm2 = vcmp.eq.f32.partialorder %v1646_v46, inf  ;;  %vm451_vm3 = vcmp.eq.f32.partialorder %v1646_v46, 0.0 }
  0xe2   :  { %v1081_v48 = vpop.eup %1080  ;;  %934 = vst [vmem:[#allocation5 + $0x78] sm:$0xff] %v822_v44  ;;  %v820_v49 = vmul.f32 %v1079_v45, %v1438_v29  ;;  %1096 = vrsqrt.f32 %v1658_v61  ;;  %v452_v30 = vand.u32 2147483648, %v1646_v46  ;;  %vm470_vm4 = vcmp.eq.f32.partialorder %v1658_v61, inf }
  0xe3   :  { %v1083_v28 = vpop.eup %1082  ;;  %v826_v5 = vmul.f32 %v1081_v48, %v1444_v32  ;;  %1098 = vrcp.f32 %v748_v55  ;;  %v422_v4 = vsel %vm421_vm10, %v1601_v11, %v420_v25  ;;  %v1709_v17 = vpop.xlane.xlu1 %217  ;;  %vm472_vm5 = vcmp.eq.f32.partialorder %v1658_v61, 0.0  ;;  %v1260_v48 = vld [vmem:[#allocation2 + $0xa0] sm:$0xff] }
  0xe4   :  { %v1711_v47 = vpop.xlane.xlu0 %215  ;;  %v1085_v29 = vpop.eup %1084  ;;  %933 = vst [vmem:[#allocation5 + $0x70] sm:$0xff] %v820_v49  ;;  %v425_v57 = vsel %vm423_vm11, %v424_v3, %v422_v4  ;;  %v441_v58 = vmul.f32 %v1083_v28, %v1619_v13  ;;  %1100 = vrsqrt.f32 %v1660_v62  ;;  %vm463_vm6 = vcmp.eq.f32.partialorder %v1660_v62, inf }
  0xe5   :  { %936 = vst [vmem:[#allocation5 + $0x88] sm:$0xff] %v826_v5  ;;  %v747_v32 = vmax.f32 %v425_v57, 1e-12  ;;  %v434_v59 = vmul.f32 %v1085_v29, %v1621_v52  ;;  %v1087_v8 = vpop.eup %1086  ;;  %1102 = vrsqrt.f32 %v1675_v0  ;;  %vm465_vm7 = vcmp.eq.f32.partialorder %v1660_v62, 0.0 }
  0xe6   :  { %v443_v11 = vsel %vm442_vm12, %v1619_v13, %v441_v58  ;;  %v1089_v10 = vpop.eup %1088  ;;  %v824_v1 = vmul.f32 %v1087_v8, %v1446_v33  ;;  %v466_v16 = vand.u32 2147483648, %v1660_v62  ;;  %vm484_vm8 = vcmp.eq.f32.partialorder %v1675_v0, inf }
  0xe7   :  { %1104 = vrcp.f32 %v747_v32  ;;  %v446_v63 = vsel %vm444_vm13, %v445_v56, %v443_v11  ;;  %v436_v9 = vsel %vm435_vm14, %v1621_v52, %v434_v59  ;;  %v1733_v31 = vpop.xlane.xlu1 %221  ;;  %v455_v14 = vmul.f32 %v1089_v10, %v1644_v51  ;;  %v1261_v59 = vld [vmem:[#allocation2 + $0xb8] sm:$0xff]  ;;  %v1262_v10 = vld [vmem:[#allocation2 + $0xb0] sm:$0xff] }
  0xe8   :  { %v1735_v53 = vpop.xlane.xlu0 %219  ;;  %v750_v20 = vmax.f32 %v446_v63, 1e-12  ;;  %v439_v34 = vsel %vm437_vm15, %v438_v60, %v436_v9  ;;  %935 = vst [vmem:[#allocation5 + $0x80] sm:$0xff] %v824_v1  ;;  %1106 = vrsqrt.f32 %v1677_v12  ;;  %vm486_vm9 = vcmp.eq.f32.partialorder %v1675_v0, 0.0 }
  0xe9   :  { %v1091_v54 = vpop.eup %1090  ;;  %v749_v33 = vmax.f32 %v439_v34, 1e-12  ;;  %v457_v21 = vsel %vm456_vm0, %v1644_v51, %v455_v14  ;;  %v473_v51 = vand.u32 2147483648, %v1658_v61  ;;  %v487_v28 = vand.u32 2147483648, %v1675_v0 }
  0xea   :  { %v1093_v13 = vpop.eup %1092  ;;  %v830_v52 = vmul.f32 %v1091_v54, %v1452_v36  ;;  %1108 = vrcp.f32 %v750_v20  ;;  %v460_v22 = vsel %vm458_vm1, %v459_v15, %v457_v21  ;;  %vm477_vm10 = vcmp.eq.f32.partialorder %v1677_v12, inf }
  0xeb   :  { %v1095_v18 = vpop.eup %1094  ;;  %v828_v19 = vmul.f32 %v1093_v13, %v1454_v37  ;;  %1110 = vrcp.f32 %v749_v33  ;;  %v1751_v23 = vpop.xlane.xlu1 %225  ;;  %v752_v36 = vmax.f32 %v460_v22, 1e-12  ;;  %vm479_vm11 = vcmp.eq.f32.partialorder %v1677_v12, 0.0 }
  0xec   :  { %v1097_v26 = vpop.eup %1096  ;;  %938 = vst [vmem:[#allocation5 + $0x98] sm:$0xff] %v830_v52  ;;  %v448_v24 = vmul.f32 %v1095_v18, %v1646_v46  ;;  %1112 = vrsqrt.f32 %v1691_v42  ;;  %v1760_v35 = vpop.xlane.xlu0 %223  ;;  %vm498_vm12 = vcmp.eq.f32.partialorder %v1691_v42, inf  ;;  %vm500_vm13 = vcmp.eq.f32.partialorder %v1691_v42, 0.0  ;;  %v1263_v52 = vld [vmem:[#allocation2 + $0xc8] sm:$0xff] }
  0xed   :  { %v1099_v27 = vpop.eup %1098  ;;  %937 = vst [vmem:[#allocation5 + $0x90] sm:$0xff] %v828_v19  ;;  %v469_v37 = vmul.f32 %v1097_v26, %v1658_v61  ;;  %1114 = vrsqrt.f32 %v1693_v43  ;;  %v501_v33 = vand.u32 2147483648, %v1691_v42  ;;  %vm491_vm14 = vcmp.eq.f32.partialorder %v1693_v43, inf }
  0xee   :  { %v1101_v6 = vpop.eup %1100  ;;  %v834_v38 = vmul.f32 %v1099_v27, %v1460_v40  ;;  %1116 = vrcp.f32 %v752_v36  ;;  %v450_v7 = vsel %vm449_vm2, %v1646_v46, %v448_v24  ;;  %vm493_vm15 = vcmp.eq.f32.partialorder %v1693_v43, 0.0 }
  0xef   :  { %v453_v39 = vsel %vm451_vm3, %v452_v30, %v450_v7  ;;  %v471_v41 = vsel %vm470_vm4, %v1658_v61, %v469_v37  ;;  %v462_v50 = vmul.f32 %v1101_v6, %v1660_v62  ;;  %v1103_v44 = vpop.eup %1102  ;;  %1118 = vrsqrt.f32 %v1709_v17  ;;  %v1783_v3 = vpop.xlane.xlu1 %229 }
  0xf0   :  { %940 = vst [vmem:[#allocation5 + $0xa8] sm:$0xff] %v834_v38  ;;  %v751_v40 = vmax.f32 %v453_v39, 1e-12  ;;  %v474_v2 = vsel %vm472_vm5, %v473_v51, %v471_v41  ;;  %v483_v25 = vmul.f32 %v1103_v44, %v1675_v0  ;;  %v1792_v29 = vpop.xlane.xlu0 %227  ;;  %v494_v30 = vand.u32 2147483648, %v1693_v43  ;;  %v1264_v38 = vld [vmem:[#allocation2 + $0xc0] sm:$0xff] }
  0xf1   :  { %v1105_v46 = vpop.eup %1104  ;;  %v754_v45 = vmax.f32 %v474_v2, 1e-12  ;;  %v464_v55 = vsel %vm463_vm6, %v1660_v62, %v462_v50  ;;  %vm512_vm0 = vcmp.eq.f32.partialorder %v1709_v17, inf  ;;  %vm514_vm1 = vcmp.eq.f32.partialorder %v1709_v17, 0.0  ;;  %v1265_v50 = vld [vmem:[#allocation2 + $0xd8] sm:$0xff] }
  0xf2   :  { %v832_v49 = vmul.f32 %v1260_v48, %v1105_v46  ;;  %1120 = vrcp.f32 %v751_v40  ;;  %v467_v61 = vsel %vm465_vm7, %v466_v16, %v464_v55  ;;  %v1107_v5 = vpop.eup %1106  ;;  %v485_v56 = vsel %vm484_vm8, %v1675_v0, %v483_v25  ;;  %v1266_v25 = vld [vmem:[#allocation2 + $0xd0] sm:$0xff] }
  0xf3   :  { %1122 = vrcp.f32 %v754_v45  ;;  %v753_v4 = vmax.f32 %v467_v61, 1e-12  ;;  %v488_v58 = vsel %vm486_vm9, %v487_v28, %v485_v56  ;;  %v476_v32 = vmul.f32 %v1107_v5, %v1677_v12  ;;  %v1807_v14 = vpop.xlane.xlu1 %233  ;;  %v1267_v56 = vld [vmem:[#allocation2 + $0xe8] sm:$0xff] }
  0xf4   :  { %v1109_v57 = vpop.eup %1108  ;;  %939 = vst [vmem:[#allocation5 + $0xa0] sm:$0xff] %v832_v49  ;;  %1124 = vrsqrt.f32 %v1711_v47  ;;  %v756_v8 = vmax.f32 %v488_v58, 1e-12  ;;  %v480_v0 = vand.u32 2147483648, %v1677_v12  ;;  %v1817_v18 = vpop.xlane.xlu0 %231  ;;  %vm505_vm2 = vcmp.eq.f32.partialorder %v1711_v47, inf }
  0xf5   :  { %v1111_v62 = vpop.eup %1110  ;;  %v838_v60 = vmul.f32 %v1261_v59, %v1109_v57  ;;  %1126 = vrcp.f32 %v753_v4  ;;  %v478_v63 = vsel %vm477_vm10, %v1677_v12, %v476_v32  ;;  %vm507_vm3 = vcmp.eq.f32.partialorder %v1711_v47, 0.0 }
  0xf6   :  { %v1113_v11 = vpop.eup %1112  ;;  %v836_v1 = vmul.f32 %v1262_v10, %v1111_v62  ;;  %1128 = vrsqrt.f32 %v1733_v31  ;;  %v481_v20 = vsel %vm479_vm11, %v480_v0, %v478_v63  ;;  %v508_v45 = vand.u32 2147483648, %v1711_v47  ;;  %v1268_v10 = vld [vmem:[#allocation2 + $0xe0] sm:$0xff] }
  0xf7   :  { %v1115_v9 = vpop.eup %1114  ;;  %942 = vst [vmem:[#allocation5 + $0xb8] sm:$0xff] %v838_v60  ;;  %1130 = vrcp.f32 %v756_v8  ;;  %v497_v34 = vmul.f32 %v1113_v11, %v1691_v42  ;;  %v755_v54 = vmax.f32 %v481_v20, 1e-12  ;;  %v1830_v39 = vpop.xlane.xlu1 %237  ;;  %vm526_vm4 = vcmp.eq.f32.partialorder %v1733_v31, inf }
  0xf8   :  { %v1117_v15 = vpop.eup %1116  ;;  %941 = vst [vmem:[#allocation5 + $0xb0] sm:$0xff] %v836_v1  ;;  %v490_v13 = vmul.f32 %v1115_v9, %v1693_v43  ;;  %1132 = vrsqrt.f32 %v1735_v53  ;;  %vm528_vm5 = vcmp.eq.f32.partialorder %v1733_v31, 0.0  ;;  %v529_v5 = vand.u32 2147483648, %v1733_v31 }
  0xf9   :  { %v842_v21 = vmul.f32 %v1263_v52, %v1117_v15  ;;  %v499_v12 = vsel %vm498_vm12, %v1691_v42, %v497_v34  ;;  %v1119_v19 = vpop.eup %1118  ;;  %1134 = vrcp.f32 %v755_v54  ;;  %v515_v42 = vand.u32 2147483648, %v1709_v17  ;;  %v1269_v52 = vld [vmem:[#allocation2 + $0xf8] sm:$0xff] }
  0xfa   :  { %v502_v22 = vsel %vm500_vm13, %v501_v33, %v499_v12  ;;  %v492_v26 = vsel %vm491_vm14, %v1693_v43, %v490_v13  ;;  %v511_v27 = vmul.f32 %v1119_v19, %v1709_v17  ;;  %1136 = vrsqrt.f32 %v1751_v23  ;;  %v1270_v19 = vld [vmem:[#allocation2 + $0xf0] sm:$0xff] }
  0xfb   :  { %944 = vst [vmem:[#allocation5 + $0xc8] sm:$0xff] %v842_v21  ;;  %v758_v36 = vmax.f32 %v502_v22, 1e-12  ;;  %v495_v24 = vsel %vm493_vm15, %v494_v30, %v492_v26  ;;  %vm519_vm6 = vcmp.eq.f32.partialorder %v1735_v53, inf  ;;  %vm521_vm7 = vcmp.eq.f32.partialorder %v1735_v53, 0.0  ;;  %v1855_v60 = vpop.xlane.xlu1 %241 }
  0xfc   :  { %v1121_v37 = vpop.eup %1120  ;;  %v757_v51 = vmax.f32 %v495_v24, 1e-12  ;;  %v513_v43 = vsel %vm512_vm0, %v1709_v17, %v511_v27  ;;  %v1836_v17 = vpop.xlane.xlu0 %235  ;;  %v522_v0 = vand.u32 2147483648, %v1735_v53  ;;  %vm540_vm8 = vcmp.eq.f32.partialorder %v1751_v23, inf }
  0xfd   :  { %v1123_v6 = vpop.eup %1122  ;;  %v840_v7 = vmul.f32 %v1264_v38, %v1121_v37  ;;  %1138 = vrcp.f32 %v758_v36  ;;  %v516_v44 = vsel %vm514_vm1, %v515_v42, %v513_v43  ;;  %vm542_vm9 = vcmp.eq.f32.partialorder %v1751_v23, 0.0 }
  0xfe   :  { %v1125_v41 = vpop.eup %1124  ;;  %v846_v16 = vmul.f32 %v1265_v50, %v1123_v6  ;;  %1140 = vrcp.f32 %v757_v51  ;;  %v760_v2 = vmax.f32 %v516_v44, 1e-12  ;;  %v543_v15 = vand.u32 2147483648, %v1751_v23 }
  0xff   :  { %v1127_v40 = vpop.eup %1126  ;;  %943 = vst [vmem:[#allocation5 + $0xc0] sm:$0xff] %v840_v7  ;;  %v504_v46 = vmul.f32 %v1125_v41, %v1711_v47  ;;  %1142 = vrsqrt.f32 %v1760_v35  ;;  %vm533_vm10 = vcmp.eq.f32.partialorder %v1760_v35, inf  ;;  %vm535_vm11 = vcmp.eq.f32.partialorder %v1760_v35, 0.0  ;;  %v1880_v36 = vpop.xlane.xlu1 %245  ;;  %v1271_v7 = vld [vmem:[#allocation2 + $0x108] sm:$0xff] }
 0x100   :  { %v1129_v55 = vpop.eup %1128  ;;  %946 = vst [vmem:[#allocation5 + $0xd8] sm:$0xff] %v846_v16  ;;  %v844_v48 = vmul.f32 %v1266_v25, %v1127_v40  ;;  %1144 = vrsqrt.f32 %v1783_v3  ;;  %v1865_v20 = vpop.xlane.xlu0 %239  ;;  %v536_v12 = vand.u32 2147483648, %v1760_v35  ;;  %vm554_vm12 = vcmp.eq.f32.partialorder %v1783_v3, inf }
 0x101   :  { %v1131_v49 = vpop.eup %1130  ;;  %1146 = vrcp.f32 %v760_v2  ;;  %v506_v61 = vsel %vm505_vm2, %v1711_v47, %v504_v46  ;;  %v525_v28 = vmul.f32 %v1129_v55, %v1733_v31  ;;  %vm556_vm13 = vcmp.eq.f32.partialorder %v1783_v3, 0.0 }
 0x102   :  { %v1133_v4 = vpop.eup %1132  ;;  %945 = vst [vmem:[#allocation5 + $0xd0] sm:$0xff] %v844_v48  ;;  %v850_v57 = vmul.f32 %v1267_v56, %v1131_v49  ;;  %v509_v58 = vsel %vm507_vm3, %v508_v45, %v506_v61  ;;  %1148 = vrsqrt.f32 %v1792_v29  ;;  %vm547_vm14 = vcmp.eq.f32.partialorder %v1792_v29, inf  ;;  %v1272_v61 = vld [vmem:[#allocation2 + $0x100] sm:$0xff] }
 0x103   :  { %v759_v32 = vmax.f32 %v509_v58, 1e-12  ;;  %v527_v62 = vsel %vm526_vm4, %v1733_v31, %v525_v28  ;;  %v518_v59 = vmul.f32 %v1133_v4, %v1735_v53  ;;  %v1135_v8 = vpop.eup %1134  ;;  %1150 = vrsqrt.f32 %v1807_v14  ;;  %v1911_v49 = vpop.xlane.xlu1 %249 }
 0x104   :  { %948 = vst [vmem:[#allocation5 + $0xe8] sm:$0xff] %v850_v57  ;;  %v530_v47 = vsel %vm528_vm5, %v529_v5, %v527_v62  ;;  %v1137_v11 = vpop.eup %1136  ;;  %v848_v1 = vmul.f32 %v1268_v10, %v1135_v8  ;;  %v1889_v6 = vpop.xlane.xlu0 %243  ;;  %vm549_vm15 = vcmp.eq.f32.partialorder %v1792_v29, 0.0  ;;  %v550_v40 = vand.u32 2147483648, %v1792_v29  ;;  %v1273_v62 = vld [vmem:[#allocation2 + $0x118] sm:$0xff] }
 0x105   :  { %1152 = vrcp.f32 %v759_v32  ;;  %v762_v63 = vmax.f32 %v530_v47, 1e-12  ;;  %v520_v9 = vsel %vm519_vm6, %v1735_v53, %v518_v59  ;;  %v539_v31 = vmul.f32 %v1137_v11, %v1751_v23 }
 0x106   :  { %v523_v34 = vsel %vm521_vm7, %v522_v0, %v520_v9  ;;  %947 = vst [vmem:[#allocation5 + $0xe0] sm:$0xff] %v848_v1  ;;  %vm568_vm0 = vcmp.eq.f32.partialorder %v1807_v14, inf  ;;  %vm570_vm1 = vcmp.eq.f32.partialorder %v1807_v14, 0.0  ;;  %v571_v5 = vand.u32 2147483648, %v1807_v14  ;;  %v1274_v1 = vld [vmem:[#allocation2 + $0x110] sm:$0xff] }
 0x107   :  { %v1139_v54 = vpop.eup %1138  ;;  %1154 = vrcp.f32 %v762_v63  ;;  %v761_v33 = vmax.f32 %v523_v34, 1e-12  ;;  %v541_v21 = vsel %vm540_vm8, %v1751_v23, %v539_v31  ;;  %v557_v23 = vand.u32 2147483648, %v1783_v3 }
 0x108   :  { %v1141_v13 = vpop.eup %1140  ;;  %v854_v53 = vmul.f32 %v1269_v52, %v1139_v54  ;;  %1156 = vrsqrt.f32 %v1817_v18  ;;  %v544_v26 = vsel %vm542_vm9, %v543_v15, %v541_v21  ;;  %vm561_vm2 = vcmp.eq.f32.partialorder %v1817_v18, inf  ;;  %v1920_v58 = vpop.xlane.xlu0 %247  ;;  %v1275_v52 = vld [vmem:[#allocation2 + $0x128] sm:$0xff] }
 0x109   :  { %v1143_v30 = vpop.eup %1142  ;;  %v852_v22 = vmul.f32 %v1270_v19, %v1141_v13  ;;  %1158 = vrcp.f32 %v761_v33  ;;  %v764_v27 = vmax.f32 %v544_v26, 1e-12  ;;  %vm563_vm3 = vcmp.eq.f32.partialorder %v1817_v18, 0.0  ;;  %v1936_v15 = vpop.xlane.xlu1 %253 }
 0x10a   :  { %v1145_v24 = vpop.eup %1144  ;;  %950 = vst [vmem:[#allocation5 + $0xf8] sm:$0xff] %v854_v53  ;;  %v532_v37 = vmul.f32 %v1143_v30, %v1760_v35  ;;  %1160 = vrsqrt.f32 %v1830_v39  ;;  %v564_v11 = vand.u32 2147483648, %v1817_v18  ;;  %vm582_vm4 = vcmp.eq.f32.partialorder %v1830_v39, inf }
 0x10b   :  { %v1147_v51 = vpop.eup %1146  ;;  %949 = vst [vmem:[#allocation5 + $0xf0] sm:$0xff] %v852_v22  ;;  %v553_v42 = vmul.f32 %v1145_v24, %v1783_v3  ;;  %1162 = vrsqrt.f32 %v1836_v17  ;;  %vm584_vm5 = vcmp.eq.f32.partialorder %v1830_v39, 0.0  ;;  %v585_v31 = vand.u32 2147483648, %v1830_v39 }
 0x10c   :  { %v1149_v38 = vpop.eup %1148  ;;  %v858_v43 = vmul.f32 %v1271_v7, %v1147_v51  ;;  %1164 = vrcp.f32 %v764_v27  ;;  %v534_v41 = vsel %vm533_vm10, %v1760_v35, %v532_v37  ;;  %vm575_vm6 = vcmp.eq.f32.partialorder %v1836_v17, inf  ;;  %v1947_v19 = vpop.xlane.xlu0 %251 }
 0x10d   :  { %v537_v50 = vsel %vm535_vm11, %v536_v12, %v534_v41  ;;  %v555_v16 = vsel %vm554_vm12, %v1783_v3, %v553_v42  ;;  %v546_v44 = vmul.f32 %v1149_v38, %v1792_v29  ;;  %v1151_v2 = vpop.eup %1150  ;;  %1166 = vrsqrt.f32 %v1855_v60  ;;  %v1276_v38 = vld [vmem:[#allocation2 + $0x120] sm:$0xff] }
 0x10e   :  { %952 = vst [vmem:[#allocation5 + $0x108] sm:$0xff] %v858_v43  ;;  %v763_v46 = vmax.f32 %v537_v50, 1e-12  ;;  %v558_v45 = vsel %vm556_vm13, %v557_v23, %v555_v16  ;;  %v567_v48 = vmul.f32 %v1151_v2, %v1807_v14  ;;  %v578_v30 = vand.u32 2147483648, %v1836_v17  ;;  %v1960_v43 = vpop.xlane.xlu1 %257  ;;  %v1277_v50 = vld [vmem:[#allocation2 + $0x138] sm:$0xff] }
 0x10f   :  { %v1153_v35 = vpop.eup %1152  ;;  %v766_v55 = vmax.f32 %v558_v45, 1e-12  ;;  %v548_v25 = vsel %vm547_vm14, %v1792_v29, %v546_v44  ;;  %vm577_vm7 = vcmp.eq.f32.partialorder %v1836_v17, 0.0  ;;  %vm596_vm8 = vcmp.eq.f32.partialorder %v1855_v60, inf }
 0x110   :  { %v856_v28 = vmul.f32 %v1272_v61, %v1153_v35  ;;  %1168 = vrcp.f32 %v763_v46  ;;  %v551_v3 = vsel %vm549_vm15, %v550_v40, %v548_v25  ;;  %v569_v57 = vsel %vm568_vm0, %v1807_v14, %v567_v48 }
 0x111   :  { %v1155_v4 = vpop.eup %1154  ;;  %1170 = vrcp.f32 %v766_v55  ;;  %v765_v56 = vmax.f32 %v551_v3, 1e-12  ;;  %v572_v29 = vsel %vm570_vm1, %v571_v5, %v569_v57  ;;  %vm598_vm9 = vcmp.eq.f32.partialorder %v1855_v60, 0.0  ;;  %v1278_v55 = vld [vmem:[#allocation2 + $0x130] sm:$0xff] }
 0x112   :  { %v1157_v32 = vpop.eup %1156  ;;  %951 = vst [vmem:[#allocation5 + $0x100] sm:$0xff] %v856_v28  ;;  %v862_v59 = vmul.f32 %v1273_v62, %v1155_v4  ;;  %1172 = vrsqrt.f32 %v1865_v20  ;;  %v768_v47 = vmax.f32 %v572_v29, 1e-12  ;;  %vm589_vm10 = vcmp.eq.f32.partialorder %v1865_v20, inf  ;;  %v1279_v4 = vld [vmem:[#allocation2 + $0x148] sm:$0xff]  ;;  %v1985_v29 = vpop.xlane.xlu1 %261 }
 0x113   :  { %v1159_v8 = vpop.eup %1158  ;;  %1174 = vrcp.f32 %v765_v56  ;;  %v560_v0 = vmul.f32 %v1157_v32, %v1817_v18  ;;  %vm591_vm11 = vcmp.eq.f32.partialorder %v1865_v20, 0.0  ;;  %v592_v45 = vand.u32 2147483648, %v1865_v20 }
 0x114   :  { %v1161_v10 = vpop.eup %1160  ;;  %954 = vst [vmem:[#allocation5 + $0x118] sm:$0xff] %v862_v59  ;;  %v860_v63 = vmul.f32 %v1274_v1, %v1159_v8  ;;  %1176 = vrsqrt.f32 %v1880_v36  ;;  %vm610_vm12 = vcmp.eq.f32.partialorder %v1880_v36, inf  ;;  %vm612_vm13 = vcmp.eq.f32.partialorder %v1880_v36, 0.0 }
 0x115   :  { %v1163_v14 = vpop.eup %1162  ;;  %1178 = vrcp.f32 %v768_v47  ;;  %v562_v9 = vsel %vm561_vm2, %v1817_v18, %v560_v0  ;;  %v581_v34 = vmul.f32 %v1161_v10, %v1830_v39  ;;  %v613_v3 = vand.u32 2147483648, %v1880_v36 }
 0x116   :  { %v1165_v54 = vpop.eup %1164  ;;  %953 = vst [vmem:[#allocation5 + $0x110] sm:$0xff] %v860_v63  ;;  %v565_v33 = vsel %vm563_vm3, %v564_v11, %v562_v9  ;;  %v574_v13 = vmul.f32 %v1163_v14, %v1836_v17  ;;  %1180 = vrsqrt.f32 %v1889_v6  ;;  %vm603_vm14 = vcmp.eq.f32.partialorder %v1889_v6, inf  ;;  %v1280_v14 = vld [vmem:[#allocation2 + $0x140] sm:$0xff] }
 0x117   :  { %v866_v53 = vmul.f32 %v1275_v52, %v1165_v54  ;;  %v767_v21 = vmax.f32 %v565_v33, 1e-12  ;;  %v583_v12 = vsel %vm582_vm4, %v1830_v39, %v581_v34  ;;  %v1167_v22 = vpop.eup %1166  ;;  %1182 = vrsqrt.f32 %v1911_v49  ;;  %v1281_v52 = vld [vmem:[#allocation2 + $0x158] sm:$0xff] }
 0x118   :  { %v586_v18 = vsel %vm584_vm5, %v585_v31, %v583_v12  ;;  %v576_v26 = vsel %vm575_vm6, %v1836_v17, %v574_v13  ;;  %v595_v37 = vmul.f32 %v1167_v22, %v1855_v60  ;;  %v599_v39 = vand.u32 2147483648, %v1855_v60  ;;  %v1282_v12 = vld [vmem:[#allocation2 + $0x150] sm:$0xff] }
 0x119   :  { %956 = vst [vmem:[#allocation5 + $0x128] sm:$0xff] %v866_v53  ;;  %1184 = vrcp.f32 %v767_v21  ;;  %v770_v24 = vmax.f32 %v586_v18, 1e-12  ;;  %v579_v27 = vsel %vm577_vm7, %v578_v30, %v576_v26  ;;  %vm605_vm15 = vcmp.eq.f32.partialorder %v1889_v6, 0.0  ;;  %v2009_v26 = vpop.xlane.xlu1 %265 }
 0x11a   :  { %v1169_v51 = vpop.eup %1168  ;;  %v769_v42 = vmax.f32 %v579_v27, 1e-12  ;;  %v597_v17 = vsel %vm596_vm8, %v1855_v60, %v595_v37  ;;  %v1966_v60 = vpop.xlane.xlu0 %255  ;;  %v606_v47 = vand.u32 2147483648, %v1889_v6  ;;  %vm624_vm0 = vcmp.eq.f32.partialorder %v1911_v49, inf }
 0x11b   :  { %v1171_v23 = vpop.eup %1170  ;;  %v864_v7 = vmul.f32 %v1276_v38, %v1169_v51  ;;  %1186 = vrcp.f32 %v770_v24  ;;  %v600_v44 = vsel %vm598_vm9, %v599_v39, %v597_v17  ;;  %vm626_vm1 = vcmp.eq.f32.partialorder %v1911_v49, 0.0 }
 0x11c   :  { %v1173_v41 = vpop.eup %1172  ;;  %v870_v16 = vmul.f32 %v1277_v50, %v1171_v23  ;;  %1188 = vrcp.f32 %v769_v42  ;;  %v772_v2 = vmax.f32 %v600_v44, 1e-12  ;;  %v627_v34 = vand.u32 2147483648, %v1911_v49  ;;  %v1283_v23 = vld [vmem:[#allocation2 + $0x168] sm:$0xff] }
 0x11d   :  { %v1175_v40 = vpop.eup %1174  ;;  %955 = vst [vmem:[#allocation5 + $0x120] sm:$0xff] %v864_v7  ;;  %v588_v46 = vmul.f32 %v1173_v41, %v1865_v20  ;;  %1190 = vrsqrt.f32 %v1920_v58  ;;  %vm617_vm2 = vcmp.eq.f32.partialorder %v1920_v58, inf  ;;  %vm619_vm3 = vcmp.eq.f32.partialorder %v1920_v58, 0.0 }
 0x11e   :  { %v1177_v35 = vpop.eup %1176  ;;  %958 = vst [vmem:[#allocation5 + $0x138] sm:$0xff] %v870_v16  ;;  %v868_v25 = vmul.f32 %v1278_v55, %v1175_v40  ;;  %1192 = vrsqrt.f32 %v1936_v15  ;;  %v1996_v63 = vpop.xlane.xlu0 %259  ;;  %v620_v18 = vand.u32 2147483648, %v1920_v58  ;;  %vm638_vm4 = vcmp.eq.f32.partialorder %v1936_v15, inf }
 0x11f   :  { %v1179_v48 = vpop.eup %1178  ;;  %1194 = vrcp.f32 %v772_v2  ;;  %v590_v61 = vsel %vm589_vm10, %v1865_v20, %v588_v46  ;;  %v609_v28 = vmul.f32 %v1177_v35, %v1880_v36  ;;  %vm640_vm5 = vcmp.eq.f32.partialorder %v1936_v15, 0.0  ;;  %v2041_v55 = vpop.xlane.xlu1 %269 }
 0x120   :  { %v1181_v5 = vpop.eup %1180  ;;  %957 = vst [vmem:[#allocation5 + $0x130] sm:$0xff] %v868_v25  ;;  %v874_v56 = vmul.f32 %v1279_v4, %v1179_v48  ;;  %v593_v57 = vsel %vm591_vm11, %v592_v45, %v590_v61  ;;  %1196 = vrsqrt.f32 %v1947_v19  ;;  %v641_v51 = vand.u32 2147483648, %v1936_v15  ;;  %v1284_v25 = vld [vmem:[#allocation2 + $0x160] sm:$0xff] }
 0x121   :  { %v771_v32 = vmax.f32 %v593_v57, 1e-12  ;;  %v611_v62 = vsel %vm610_vm12, %v1880_v36, %v609_v28  ;;  %v602_v59 = vmul.f32 %v1181_v5, %v1889_v6  ;;  %v1183_v8 = vpop.eup %1182  ;;  %1198 = vrsqrt.f32 %v1960_v43  ;;  %v1285_v57 = vld [vmem:[#allocation2 + $0x178] sm:$0xff] }
 0x122   :  { %960 = vst [vmem:[#allocation5 + $0x148] sm:$0xff] %v874_v56  ;;  %v614_v20 = vsel %vm612_vm13, %v613_v3, %v611_v62  ;;  %v623_v1 = vmul.f32 %v1183_v8, %v1911_v49  ;;  %vm631_vm6 = vcmp.eq.f32.partialorder %v1947_v19, inf  ;;  %v2018_v42 = vpop.xlane.xlu0 %263  ;;  %vm633_vm7 = vcmp.eq.f32.partialorder %v1947_v19, 0.0 }
 0x123   :  { %v1185_v0 = vpop.eup %1184  ;;  %1200 = vrcp.f32 %v771_v32  ;;  %v774_v11 = vmax.f32 %v614_v20, 1e-12  ;;  %v604_v10 = vsel %vm603_vm14, %v1889_v6, %v602_v59  ;;  %v634_v16 = vand.u32 2147483648, %v1947_v19 }
 0x124   :  { %v872_v36 = vmul.f32 %v1280_v14, %v1185_v0  ;;  %v607_v9 = vsel %vm605_vm15, %v606_v47, %v604_v10  ;;  %v625_v33 = vsel %vm624_vm0, %v1911_v49, %v623_v1  ;;  %vm652_vm8 = vcmp.eq.f32.partialorder %v1960_v43, inf  ;;  %v1286_v0 = vld [vmem:[#allocation2 + $0x170] sm:$0xff] }
 0x125   :  { %v1187_v31 = vpop.eup %1186  ;;  %1202 = vrcp.f32 %v774_v11  ;;  %v773_v54 = vmax.f32 %v607_v9, 1e-12  ;;  %v628_v21 = vsel %vm626_vm1, %v627_v34, %v625_v33  ;;  %vm654_vm9 = vcmp.eq.f32.partialorder %v1960_v43, 0.0  ;;  %v1287_v34 = vld [vmem:[#allocation2 + $0x188] sm:$0xff] }
 0x126   :  { %v1189_v13 = vpop.eup %1188  ;;  %959 = vst [vmem:[#allocation5 + $0x140] sm:$0xff] %v872_v36  ;;  %v878_v53 = vmul.f32 %v1281_v52, %v1187_v31  ;;  %1204 = vrsqrt.f32 %v1966_v60  ;;  %v776_v22 = vmax.f32 %v628_v21, 1e-12  ;;  %v655_v61 = vand.u32 2147483648, %v1960_v43  ;;  %v2050_v4 = vpop.xlane.xlu0 %267 }
 0x127   :  { %v1191_v6 = vpop.eup %1190  ;;  %v876_v30 = vmul.f32 %v1282_v12, %v1189_v13  ;;  %1206 = vrcp.f32 %v773_v54  ;;  %vm645_vm10 = vcmp.eq.f32.partialorder %v1966_v60, inf  ;;  %vm647_vm11 = vcmp.eq.f32.partialorder %v1966_v60, 0.0  ;;  %v2066_v36 = vpop.xlane.xlu1 %273 }
 0x128   :  { %v1193_v49 = vpop.eup %1192  ;;  %962 = vst [vmem:[#allocation5 + $0x158] sm:$0xff] %v878_v53  ;;  %v616_v24 = vmul.f32 %v1191_v6, %v1920_v58  ;;  %1208 = vrsqrt.f32 %v1985_v29  ;;  %v648_v20 = vand.u32 2147483648, %v1966_v60  ;;  %vm666_vm12 = vcmp.eq.f32.partialorder %v1985_v29, inf }
 0x129   :  { %v1195_v27 = vpop.eup %1194  ;;  %961 = vst [vmem:[#allocation5 + $0x150] sm:$0xff] %v876_v30  ;;  %1210 = vrcp.f32 %v776_v22  ;;  %v637_v37 = vmul.f32 %v1193_v49, %v1936_v15  ;;  %vm668_vm13 = vcmp.eq.f32.partialorder %v1985_v29, 0.0  ;;  %v669_v14 = vand.u32 2147483648, %v1985_v29 }
 0x12a   :  { %v1197_v39 = vpop.eup %1196  ;;  %v882_v38 = vmul.f32 %v1283_v23, %v1195_v27  ;;  %v618_v7 = vsel %vm617_vm2, %v1920_v58, %v616_v24  ;;  %1212 = vrsqrt.f32 %v1996_v63  ;;  %vm659_vm14 = vcmp.eq.f32.partialorder %v1996_v63, inf  ;;  %v2077_v53 = vpop.xlane.xlu0 %271  ;;  %v1288_v27 = vld [vmem:[#allocation2 + $0x180] sm:$0xff] }
 0x12b   :  { %v621_v17 = vsel %vm619_vm3, %v620_v18, %v618_v7  ;;  %v639_v41 = vsel %vm638_vm4, %v1936_v15, %v637_v37  ;;  %v630_v50 = vmul.f32 %v1197_v39, %v1947_v19  ;;  %v1199_v44 = vpop.eup %1198  ;;  %1214 = vrsqrt.f32 %v2009_v26 }
 0x12c   :  { %964 = vst [vmem:[#allocation5 + $0x168] sm:$0xff] %v882_v38  ;;  %v775_v40 = vmax.f32 %v621_v17, 1e-12  ;;  %v642_v2 = vsel %vm640_vm5, %v641_v51, %v639_v41  ;;  %v651_v35 = vmul.f32 %v1199_v44, %v1960_v43  ;;  %vm661_vm15 = vcmp.eq.f32.partialorder %v1996_v63, 0.0  ;;  %v1289_v38 = vld [vmem:[#allocation2 + $0x198] sm:$0xff] }
 0x12d   :  { %v1201_v58 = vpop.eup %1200  ;;  %v778_v46 = vmax.f32 %v642_v2, 1e-12  ;;  %v632_v45 = vsel %vm631_vm6, %v1947_v19, %v630_v50  ;;  %v662_v6 = vand.u32 2147483648, %v1996_v63  ;;  %vm680_vm0 = vcmp.eq.f32.partialorder %v2009_v26, inf }
 0x12e   :  { %v880_v48 = vmul.f32 %v1284_v25, %v1201_v58  ;;  %1216 = vrcp.f32 %v775_v40  ;;  %v635_v15 = vsel %vm633_vm7, %v634_v16, %v632_v45  ;;  %v653_v5 = vsel %vm652_vm8, %v1960_v43, %v651_v35  ;;  %v2097_v44 = vpop.xlane.xlu0 %275 }
 0x12f   :  { %v1203_v28 = vpop.eup %1202  ;;  %1218 = vrcp.f32 %v778_v46  ;;  %v777_v3 = vmax.f32 %v635_v15, 1e-12  ;;  %v656_v19 = vsel %vm654_vm9, %v655_v61, %v653_v5  ;;  %vm682_vm1 = vcmp.eq.f32.partialorder %v2009_v26, 0.0 }
 0x130   :  { %v1205_v56 = vpop.eup %1204  ;;  %963 = vst [vmem:[#allocation5 + $0x160] sm:$0xff] %v880_v48  ;;  %v886_v32 = vmul.f32 %v1285_v57, %v1203_v28  ;;  %1220 = vrsqrt.f32 %v2018_v42  ;;  %v780_v59 = vmax.f32 %v656_v19, 1e-12  ;;  %v683_v24 = vand.u32 2147483648, %v2009_v26  ;;  %v1291_v48 = vld [vmem:[#allocation2 + $0x1a8] sm:$0xff] }
 0x131   :  { %v1207_v62 = vpop.eup %1206  ;;  %1222 = vrcp.f32 %v777_v3  ;;  %v644_v8 = vmul.f32 %v1205_v56, %v1966_v60  ;;  %vm673_vm2 = vcmp.eq.f32.partialorder %v2018_v42, inf  ;;  %vm675_vm3 = vcmp.eq.f32.partialorder %v2018_v42, 0.0 }
 0x132   :  { %v1209_v47 = vpop.eup %1208  ;;  %966 = vst [vmem:[#allocation5 + $0x178] sm:$0xff] %v886_v32  ;;  %v884_v11 = vmul.f32 %v1286_v0, %v1207_v62  ;;  %1224 = vrsqrt.f32 %v2041_v55  ;;  %v676_v58 = vand.u32 2147483648, %v2018_v42  ;;  %vm694_vm4 = vcmp.eq.f32.partialorder %v2041_v55, inf }
 0x133   :  { %v1211_v43 = vpop.eup %1210  ;;  %1226 = vrcp.f32 %v780_v59  ;;  %v646_v10 = vsel %vm645_vm10, %v1966_v60, %v644_v8  ;;  %v665_v1 = vmul.f32 %v1209_v47, %v1985_v29  ;;  %vm696_vm5 = vcmp.eq.f32.partialorder %v2041_v55, 0.0 }
 0x134   :  { %v1213_v9 = vpop.eup %1212  ;;  %965 = vst [vmem:[#allocation5 + $0x170] sm:$0xff] %v884_v11  ;;  %v890_v31 = vmul.f32 %v1287_v34, %v1211_v43  ;;  %v649_v54 = vsel %vm647_vm11, %v648_v20, %v646_v10  ;;  %1228 = vrsqrt.f32 %v2050_v4  ;;  %v697_v28 = vand.u32 2147483648, %v2041_v55  ;;  %v1292_v20 = vld [vmem:[#allocation2 + $0x1a0] sm:$0xff] }
 0x135   :  { %v779_v33 = vmax.f32 %v649_v54, 1e-12  ;;  %v667_v13 = vsel %vm666_vm12, %v1985_v29, %v665_v1  ;;  %v658_v52 = vmul.f32 %v1213_v9, %v1996_v63  ;;  %v1215_v21 = vpop.eup %1214  ;;  %1230 = vrsqrt.f32 %v2066_v36  ;;  %v1293_v9 = vld [vmem:[#allocation2 + $0x1b8] sm:$0xff] }
 0x136   :  { %968 = vst [vmem:[#allocation5 + $0x188] sm:$0xff] %v890_v31  ;;  %v670_v60 = vsel %vm668_vm13, %v669_v14, %v667_v13  ;;  %v679_v22 = vmul.f32 %v1215_v21, %v2009_v26  ;;  %vm687_vm6 = vcmp.eq.f32.partialorder %v2050_v4, inf  ;;  %vm689_vm7 = vcmp.eq.f32.partialorder %v2050_v4, 0.0 }
 0x137   :  { %1232 = vrcp.f32 %v779_v33  ;;  %v782_v12 = vmax.f32 %v670_v60, 1e-12  ;;  %v660_v30 = vsel %vm659_vm14, %v1996_v63, %v658_v52  ;;  %v2092_v63 = vpop.xlane.xlu1 %277  ;;  %v690_v19 = vand.u32 2147483648, %v2050_v4 }
 0x138   :  { %v1217_v18 = vpop.eup %1216  ;;  %v663_v49 = vsel %vm661_vm15, %v662_v6, %v660_v30  ;;  %1234 = vrsqrt.f32 %v2077_v53  ;;  %v681_v39 = vsel %vm680_vm0, %v2009_v26, %v679_v22  ;;  %v1290_v26 = vld [vmem:[#allocation2 + $0x190] sm:$0xff]  ;;  %vm708_vm8 = vcmp.eq.f32.partialorder %v2066_v36, inf }
 0x139   :  { %v1219_v29 = vpop.eup %1218  ;;  %v888_v37 = vmul.f32 %v1288_v27, %v1217_v18  ;;  %1236 = vrcp.f32 %v782_v12  ;;  %v781_v51 = vmax.f32 %v663_v49, 1e-12  ;;  %v684_v17 = vsel %vm682_vm1, %v683_v24, %v681_v39  ;;  %v1295_v18 = vld [vmem:[#allocation2 + $0x1c8] sm:$0xff] }
 0x13a   :  { %v1221_v23 = vpop.eup %1220  ;;  %v894_v7 = vmul.f32 %v1289_v38, %v1219_v29  ;;  %v784_v50 = vmax.f32 %v684_v17, 1e-12  ;;  %vm710_vm9 = vcmp.eq.f32.partialorder %v2066_v36, 0.0  ;;  %v711_v11 = vand.u32 2147483648, %v2066_v36  ;;  %v1296_v38 = vld [vmem:[#allocation2 + $0x1c0] sm:$0xff] }
 0x13b   :  { %v1223_v41 = vpop.eup %1222  ;;  %967 = vst [vmem:[#allocation5 + $0x180] sm:$0xff] %v888_v37  ;;  %1238 = vrcp.f32 %v781_v51  ;;  %v672_v16 = vmul.f32 %v1221_v23, %v2018_v42  ;;  %vm701_vm10 = vcmp.eq.f32.partialorder %v2077_v53, inf  ;;  %v704_v31 = vand.u32 2147483648, %v2077_v53 }
 0x13c   :  { %v1225_v40 = vpop.eup %1224  ;;  %970 = vst [vmem:[#allocation5 + $0x198] sm:$0xff] %v894_v7  ;;  %v892_v2 = vmul.f32 %v1290_v26, %v1223_v41  ;;  %1240 = vrsqrt.f32 %v2092_v63  ;;  %vm703_vm11 = vcmp.eq.f32.partialorder %v2077_v53, 0.0  ;;  %vm722_vm12 = vcmp.eq.f32.partialorder %v2092_v63, inf  ;;  %v1298_v26 = vld [vmem:[#allocation2 + $0x1d0] sm:$0xff] }
 0x13d   :  { %v1227_v46 = vpop.eup %1226  ;;  %1242 = vrcp.f32 %v784_v50  ;;  %v674_v45 = vsel %vm673_vm2, %v2018_v42, %v672_v16  ;;  %v693_v35 = vmul.f32 %v1225_v40, %v2041_v55  ;;  %v725_v24 = vand.u32 2147483648, %v2092_v63  ;;  %v1297_v50 = vld [vmem:[#allocation2 + $0x1d8] sm:$0xff] }
 0x13e   :  { %v1229_v25 = vpop.eup %1228  ;;  %969 = vst [vmem:[#allocation5 + $0x190] sm:$0xff] %v892_v2  ;;  %v898_v15 = vmul.f32 %v1291_v48, %v1227_v46  ;;  %v677_v61 = vsel %vm675_vm3, %v676_v58, %v674_v45  ;;  %1244 = vrsqrt.f32 %v2097_v44  ;;  %vm724_vm13 = vcmp.eq.f32.partialorder %v2092_v63, 0.0  ;;  %v1299_v46 = vld [vmem:[#allocation2 + $0x1e8] sm:$0xff] }
 0x13f   :  { %v783_v3 = vmax.f32 %v677_v61, 1e-12  ;;  %v695_v5 = vsel %vm694_vm4, %v2041_v55, %v693_v35  ;;  %v686_v56 = vmul.f32 %v1229_v25, %v2050_v4  ;;  %v1231_v57 = vpop.eup %1230  ;;  %vm715_vm14 = vcmp.eq.f32.partialorder %v2097_v44, inf }
 0x140   :  { %972 = vst [vmem:[#allocation5 + $0x1a8] sm:$0xff] %v898_v15  ;;  %v698_v32 = vsel %vm696_vm5, %v697_v28, %v695_v5  ;;  %v707_v55 = vmul.f32 %v1231_v57, %v2066_v36  ;;  %v718_v37 = vand.u32 2147483648, %v2097_v44  ;;  %vm717_vm15 = vcmp.eq.f32.partialorder %v2097_v44, 0.0  ;;  %v1301_v15 = vld [vmem:[#allocation2 + $0x1f8] sm:$0xff] }
 0x141   :  { %v1233_v42 = vpop.eup %1232  ;;  %1246 = vrcp.f32 %v783_v3  ;;  %v786_v62 = vmax.f32 %v698_v32, 1e-12  ;;  %v688_v59 = vsel %vm687_vm6, %v2050_v4, %v686_v56  ;;  %v1302_v3 = vld [vmem:[#allocation2 + $0x1f0] sm:$0xff] }
 0x142   :  { %v1235_v8 = vpop.eup %1234  ;;  %v896_v47 = vmul.f32 %v1292_v20, %v1233_v42  ;;  %v691_v0 = vsel %vm689_vm7, %v690_v19, %v688_v59  ;;  %v709_v1 = vsel %vm708_vm8, %v2066_v36, %v707_v55  ;;  %v1294_v36 = vld [vmem:[#allocation2 + $0x1b0] sm:$0xff] }
 0x143   :  { %v1237_v43 = vpop.eup %1236  ;;  %1248 = vrcp.f32 %v786_v62  ;;  %v785_v10 = vmax.f32 %v691_v0, 1e-12  ;;  %v700_v14 = vmul.f32 %v1235_v8, %v2077_v53  ;;  %v712_v34 = vsel %vm710_vm9, %v711_v11, %v709_v1 }
 0x144   :  { %971 = vst [vmem:[#allocation5 + $0x1a0] sm:$0xff] %v896_v47  ;;  %v902_v4 = vmul.f32 %v1293_v9, %v1237_v43  ;;  %v788_v33 = vmax.f32 %v712_v34, 1e-12 }
 0x145   :  { %v1239_v54 = vpop.eup %1238  ;;  %1250 = vrcp.f32 %v785_v10  ;;  %v702_v13 = vsel %vm701_vm10, %v2077_v53, %v700_v14 }
 0x146   :  { %v1241_v52 = vpop.eup %1240  ;;  %974 = vst [vmem:[#allocation5 + $0x1b8] sm:$0xff] %v902_v4  ;;  %v900_v21 = vmul.f32 %v1294_v36, %v1239_v54  ;;  %v705_v60 = vsel %vm703_vm11, %v704_v31, %v702_v13  ;;  %1252 = vrcp.f32 %v788_v33 }
 0x147   :  { %v1243_v6 = vpop.eup %1242  ;;  %v787_v12 = vmax.f32 %v705_v60, 1e-12  ;;  %v721_v30 = vmul.f32 %v1241_v52, %v2092_v63 }
 0x148   :  { %v1245_v22 = vpop.eup %1244  ;;  %973 = vst [vmem:[#allocation5 + $0x1b0] sm:$0xff] %v900_v21  ;;  %v906_v49 = vmul.f32 %v1295_v18, %v1243_v6 }
 0x149   :  { %1254 = vrcp.f32 %v787_v12  ;;  %v723_v53 = vsel %vm722_vm12, %v2092_v63, %v721_v30  ;;  %v714_v29 = vmul.f32 %v1245_v22, %v2097_v44 }
 0x14a   :  { %976 = vst [vmem:[#allocation5 + $0x1c8] sm:$0xff] %v906_v49  ;;  %v726_v27 = vsel %vm724_vm13, %v725_v24, %v723_v53 }
 0x14b   :  { %v1247_v51 = vpop.eup %1246  ;;  %v790_v39 = vmax.f32 %v726_v27, 1e-12  ;;  %v716_v23 = vsel %vm715_vm14, %v2097_v44, %v714_v29  ;;  %v1300_v44 = vld [vmem:[#allocation2 + $0x1e0] sm:$0xff] }
 0x14c   :  { %v904_v7 = vmul.f32 %v1296_v38, %v1247_v51  ;;  %v719_v17 = vsel %vm717_vm15, %v718_v37, %v716_v23 }
 0x14d   :  { %v1249_v41 = vpop.eup %1248  ;;  %1256 = vrcp.f32 %v790_v39  ;;  %v789_v63 = vmax.f32 %v719_v17, 1e-12 }
 0x14e   :  { %975 = vst [vmem:[#allocation5 + $0x1c0] sm:$0xff] %v904_v7  ;;  %v910_v16 = vmul.f32 %v1297_v50, %v1249_v41 }
 0x14f   :  { %v1251_v40 = vpop.eup %1250  ;;  %1258 = vrcp.f32 %v789_v63 }
 0x150   :  { %978 = vst [vmem:[#allocation5 + $0x1d8] sm:$0xff] %v910_v16  ;;  %v908_v2 = vmul.f32 %v1298_v26, %v1251_v40  ;;  %v1253_v58 = vpop.eup %1252 }
 0x151   :  { %v914_v45 = vmul.f32 %v1299_v46, %v1253_v58 }
 0x152   :  { %977 = vst [vmem:[#allocation5 + $0x1d0] sm:$0xff] %v908_v2 }
 0x153   :  { %v1255_v35 = vpop.eup %1254  ;;  %980 = vst [vmem:[#allocation5 + $0x1e8] sm:$0xff] %v914_v45 }
 0x154   :  { %v912_v25 = vmul.f32 %v1300_v44, %v1255_v35 }
 0x156   :  { %979 = vst [vmem:[#allocation5 + $0x1e0] sm:$0xff] %v912_v25 }
 0x157   :  { %v1257_v48 = vpop.eup %1256 }
 0x158   :  { %v918_v61 = vmul.f32 %v1301_v15, %v1257_v48 }
 0x159   :  { %v1259_v28 = vpop.eup %1258 }
 0x15a   :  { %982 = vst [vmem:[#allocation5 + $0x1f8] sm:$0xff] %v918_v61  ;;  %v916_v5 = vmul.f32 %v1302_v3, %v1259_v28 }
 0x15c   :  { %981 = vst [vmem:[#allocation5 + $0x1f0] sm:$0xff] %v916_v5 }
 0x15d   :  { %1336 = shalt.err (!%p1333_p12)
}
 0x15e   :  { %s1337_s24 = scalar_lea.hbm %s2153_s1, 8192 }
 0x15f   :  { %p1338_p13 = scmp.ne.s32.totalorder %s2153_s1, %s1337_s24  ;;  %p1341_p0 = scmp.lt.u32.totalorder %s1337_s24, %s2153_s1 }
 0x161   :  { %p1343_p1 = pnand %p1341_p0, %p1338_p13 }
 0x163   :  { %1346 = shalt.err (!%p1343_p1)
}
 0x164   :  { %994 = dma.vmem_to_hbm [thread:$0]  %s989_s20, 8192, %s2153_s1, [#allocation4], %s1352_s16, %s1352_s16, %s1353_s17  }
 0x165   :  { %1349 = dma.done.wait [#allocation4], 8192  }
 0x166   :  { %1350 = vsyncadd [#allocation4], 4294959104 }
 0x167   :  { %998 = vsyncpa [#allocation3], 1 }
 0x168   :  { %999 = vsyncpa [#allocation4], 1 }

</bundles_post_ra>
